<compile_context>
chip_gen: v7x
topology: tpu7x:2x2x1
jax: 0.10.0
libtpu: 0.0.40
codegen_flags: <defaults>
</compile_context>

<pallas_src>
import functools

import jax
import jax.numpy as jnp
import numpy as np
from jax import lax
from jax.experimental import pallas as pl
from jax.experimental.pallas import tpu as pltpu


def _round_up(x, m):
    return (x + m - 1) // m * m


_VMEM_LIMIT = 32 * 1024 * 1024  # well under v7x's 64 MiB physical VMEM


# ----------------------------------------------------------------------------
# Kernel 1: QKV projection, lane-dense (B, N, inner_pad) outputs
# ----------------------------------------------------------------------------
def qkv_proj_kernel(x_ref, w_ref, q_ref, k_ref, v_ref, *, inner_pad):
    """x:(1,tn,D) bf16 ; w:(D,3*inner_pad) bf16 packed [Q|K|V], head-major,
    zero-padded heads, scale folded into Q columns ; q/k/v:(1,tn,inner_pad) bf16."""
    x = x_ref[0]                                           # (tn, D) bf16
    for idx, dst in enumerate((q_ref, k_ref, v_ref)):
        # 512-wide, 128-aligned weight slice: lane-dense, no relayout.
        w = w_ref[:, idx * inner_pad:(idx + 1) * inner_pad]
        dst[0] = jnp.dot(x, w,
                         preferred_element_type=jnp.float32).astype(dst.dtype)


# ----------------------------------------------------------------------------
# Kernel 2: flash attention (online softmax over kv tiles) + fused out-proj
# ----------------------------------------------------------------------------
def flash_attn_kernel(q_ref, k_ref, v_ref, wo_ref, bo_ref, o_ref,
                      m_sc, l_sc, acc_sc, obf_sc, *, heads, dh_pad):
    """q:(1,tq,inner_pad) pre-scaled bf16 ; k/v:(1,tk,inner_pad) bf16 ;
    wo:(inner_pad,D) bf16 (padded rows zero) ; bo:(1,D) f32 ; o:(1,tq,D).
    Scratch: m/l:(H,tq,1) f32, acc:(tq,inner_pad) f32, obf:(tq,inner_pad) bf16."""
    j = pl.program_id(2)

    @pl.when(j == 0)
    def _init():
        m_sc[...] = jnp.full(m_sc.shape, -jnp.inf, dtype=m_sc.dtype)
        l_sc[...] = jnp.zeros(l_sc.shape, dtype=l_sc.dtype)
        acc_sc[...] = jnp.zeros(acc_sc.shape, dtype=acc_sc.dtype)

    # Per-head processing bounds live f32 temps to one (tq, tk) tile at a time.
    for h in range(heads):
        sl = slice(h * dh_pad, (h + 1) * dh_pad)           # 128-aligned lanes
        qh = q_ref[0, :, sl]                               # (tq, dh_pad) bf16
        kh = k_ref[0, :, sl]                               # (tk, dh_pad) bf16
        vh = v_ref[0, :, sl]                               # (tk, dh_pad) bf16

        # Scores: q @ k^T via dot_general (no explicit transpose), f32 acc.
        s = lax.dot_general(qh, kh, (((1,), (1,)), ((), ())),
                            preferred_element_type=jnp.float32)   # (tq, tk)

        m_prev = m_sc[h]                                   # (tq, 1) f32
        m_new = jnp.maximum(m_prev, jnp.max(s, axis=-1, keepdims=True))
        alpha = jnp.exp(m_prev - m_new)                    # (tq, 1) f32
        p = jnp.exp(s - m_new)                             # (tq, tk) f32

        l_sc[h] = alpha * l_sc[h] + jnp.sum(p, axis=-1, keepdims=True)
        acc_sc[:, sl] = alpha * acc_sc[:, sl] + jnp.dot(
            p.astype(vh.dtype), vh, preferred_element_type=jnp.float32)
        m_sc[h] = m_new

    @pl.when(j == pl.num_programs(2) - 1)
    def _finalize():
        # Normalize per head (exact reciprocal), then ONE wide K=inner_pad
        # contraction against w_out; final store is lane-dense (last dim = D).
        for h in range(heads):
            sl = slice(h * dh_pad, (h + 1) * dh_pad)
            inv_l = pl.reciprocal(l_sc[h], approx=False)   # (tq, 1)
            obf_sc[:, sl] = (acc_sc[:, sl] * inv_l).astype(obf_sc.dtype)
        proj = jnp.dot(obf_sc[...], wo_ref[...],
                       preferred_element_type=jnp.float32)  # (tq, D)
        o_ref[0] = (proj + bo_ref[...]).astype(o_ref.dtype)


# ----------------------------------------------------------------------------
# Wrapper
# ----------------------------------------------------------------------------
def attention_forward(x, w_qkv, w_out, b_out, *, heads, dim_head,
                      tn=512, tq=256, tk=256):
    """x:(B,N,D) ; w_qkv:(D,3*inner) ; w_out:(inner,D) ; b_out:(D,)."""
    B, N, D = x.shape
    inner = heads * dim_head
    assert w_qkv.shape == (D, 3 * inner)
    assert w_out.shape == (inner, D)
    scale = dim_head ** (-0.5)

    # Pad dim_head up to a multiple of 128 so every last dim is lane-dense.
    dh_pad = _round_up(dim_head, 128)
    inner_pad = heads * dh_pad

    tn = min(tn, N); tq = min(tq, N); tk = min(tk, N)
    assert N % tn == 0 and N % tq == 0 and N % tk == 0, "N must divide tile sizes"

    # --- wrapper-side layout plumbing (one-time) ------------------------------
    def pad_head_cols(w):                       # (D, inner) -> (D, inner_pad)
        w = w.reshape(D, heads, dim_head)
        w = jnp.pad(w, ((0, 0), (0, 0), (0, dh_pad - dim_head)))
        return w.reshape(D, inner_pad)

    wq = pad_head_cols(w_qkv[:, :inner]) * scale            # fold softmax scale
    wk = pad_head_cols(w_qkv[:, inner:2 * inner])
    wv = pad_head_cols(w_qkv[:, 2 * inner:])
    w_packed = jnp.concatenate([wq, wk, wv], axis=1).astype(jnp.bfloat16)

    wo = w_out.reshape(heads, dim_head, D)
    wo = jnp.pad(wo, ((0, 0), (0, dh_pad - dim_head), (0, 0)))
    wo = wo.reshape(inner_pad, D).astype(jnp.bfloat16)       # (inner_pad, D)
    bo = b_out.reshape(1, D).astype(jnp.float32)
    x_bf16 = x.astype(jnp.bfloat16)

    # --- Kernel 1: QKV projection, flat lane-dense (B, N, inner_pad) ----------
    qkv_shape = jax.ShapeDtypeStruct((B, N, inner_pad), jnp.bfloat16)
    q, k, v = pl.pallas_call(
        functools.partial(qkv_proj_kernel, inner_pad=inner_pad),
        out_shape=(qkv_shape, qkv_shape, qkv_shape),
        grid=(B, N // tn),
        in_specs=[
            pl.BlockSpec((1, tn, D), lambda b, i: (b, i, 0)),
            # Constant index_map -> weights are not re-DMA'd across grid steps.
            pl.BlockSpec((D, 3 * inner_pad), lambda b, i: (0, 0)),
        ],
        out_specs=[
            pl.BlockSpec((1, tn, inner_pad), lambda b, i: (b, i, 0)),
            pl.BlockSpec((1, tn, inner_pad), lambda b, i: (b, i, 0)),
            pl.BlockSpec((1, tn, inner_pad), lambda b, i: (b, i, 0)),
        ],
        compiler_params=pltpu.CompilerParams(
            dimension_semantics=("parallel", "parallel"),
            vmem_limit_bytes=_VMEM_LIMIT),
    )(x_bf16, w_packed)

    # --- Kernel 2: flash attention + fused output projection ------------------
    out = pl.pallas_call(
        functools.partial(flash_attn_kernel, heads=heads, dh_pad=dh_pad),
        out_shape=jax.ShapeDtypeStruct((B, N, D), x.dtype),
        grid=(B, N // tq, N // tk),                  # kv reduction axis last
        in_specs=[
            pl.BlockSpec((1, tq, inner_pad), lambda b, i, j: (b, i, 0)),
            pl.BlockSpec((1, tk, inner_pad), lambda b, i, j: (b, j, 0)),
            pl.BlockSpec((1, tk, inner_pad), lambda b, i, j: (b, j, 0)),
            pl.BlockSpec((inner_pad, D), lambda b, i, j: (0, 0)),
            pl.BlockSpec((1, D), lambda b, i, j: (0, 0)),
        ],
        out_specs=pl.BlockSpec((1, tq, D), lambda b, i, j: (b, i, 0)),
        scratch_shapes=[
            pltpu.VMEM((heads, tq, 1), jnp.float32),        # running max
            pltpu.VMEM((heads, tq, 1), jnp.float32),        # running sum
            pltpu.VMEM((tq, inner_pad), jnp.float32),       # f32 accumulator
            pltpu.VMEM((tq, inner_pad), jnp.bfloat16),      # normalized o (bf16)
        ],
        compiler_params=pltpu.CompilerParams(
            dimension_semantics=("parallel", "parallel", "arbitrary"),
            vmem_limit_bytes=_VMEM_LIMIT),
    )(q, k, v, wo, bo)
    return out


# ----------------------------------------------------------------------------
# Plain-JAX f32 reference mirroring the PyTorch forward (eval mode)
# ----------------------------------------------------------------------------
def attention_reference(x, w_qkv, w_out, b_out, *, heads, dim_head):
    B, N, D = x.shape
    inner = heads * dim_head
    scale = dim_head ** (-0.5)
    qkv = jnp.einsum("bnd,de->bne", x, w_qkv)
    q, k, v = jnp.split(qkv, 3, axis=-1)

    def split_heads(t):  # b n (h d) -> b h n d
        return t.reshape(B, N, heads, dim_head).transpose(0, 2, 1, 3)

    q, k, v = map(split_heads, (q, k, v))
    dots = jnp.einsum("bhnd,bhmd->bhnm", q, k) * scale
    attn = jax.nn.softmax(dots, axis=-1)
    out = jnp.einsum("bhnm,bhmd->bhnd", attn, v)
    out = out.transpose(0, 2, 1, 3).reshape(B, N, inner)
    return jnp.einsum("bne,ed->bnd", out, w_out) + b_out


if __name__ == "__main__":
    # Small shapes consistent with the module (inner_dim = heads * dim_head).
    B, N = 2, 256
    dim, heads, dim_head = 128, 4, 64
    inner = heads * dim_head

    key = jax.random.PRNGKey(0)
    kx, kqkv, kwo, kbo = jax.random.split(key, 4)

    x = jax.random.normal(kx, (B, N, dim), dtype=jnp.float32)
    # PyTorch Linear weight is (out, in); we store the already-transposed
    # (in, out) layout used for right-multiplication.
    w_qkv = jax.random.normal(kqkv, (dim, 3 * inner), dtype=jnp.float32) * (dim ** -0.5)
    w_out = jax.random.normal(kwo, (inner, dim), dtype=jnp.float32) * (inner ** -0.5)
    b_out = jax.random.normal(kbo, (dim,), dtype=jnp.float32) * 0.01

    y = attention_forward(x, w_qkv, w_out, b_out, heads=heads, dim_head=dim_head)
    y = jax.block_until_ready(y)

    y_ref = attention_reference(x, w_qkv, w_out, b_out, heads=heads, dim_head=dim_head)
    # bf16 matmul operands (f32 accumulation) vs. f32 reference -> loose-ish tol.
    np.testing.assert_allclose(np.asarray(y), np.asarray(y_ref), rtol=2e-2, atol=2e-2)

    print("KERNEL_OK")
</pallas_src>

<mosaic_0001>
module attributes {stable_mosaic.version = 11 : i64} {
  func.func @qkv_proj_kernel(%arg0: i32, %arg1: i32, %arg2: memref<1x256x128xbf16, #tpu.memory_space<vmem>>, %arg3: memref<128x1536xbf16, #tpu.memory_space<vmem>>, %arg4: memref<1x256x512xbf16, #tpu.memory_space<vmem>>, %arg5: memref<1x256x512xbf16, #tpu.memory_space<vmem>>, %arg6: memref<1x256x512xbf16, #tpu.memory_space<vmem>>) attributes {dimension_semantics = [#tpu.dimension_semantics<parallel>, #tpu.dimension_semantics<parallel>], iteration_bounds = array<i64: 2, 1>, scalar_prefetch = 0 : i64, scratch_operands = 0 : i64, tpu.core_type = #tpu.core_type<tc>, window_params = [{transform_indices = @transform_0, window_bounds = array<i64: 1, 256, 128>}, {pipeline_mode = #tpu.pipeline_mode<synchronous>, transform_indices = @transform_1, window_bounds = array<i64: 128, 1536>}, {transform_indices = @transform_2, window_bounds = array<i64: 1, 256, 512>}, {transform_indices = @transform_3, window_bounds = array<i64: 1, 256, 512>}, {transform_indices = @transform_4, window_bounds = array<i64: 1, 256, 512>}]} {
    %c0 = arith.constant 0 : index
    %c0_0 = arith.constant 0 : index
    %c0_1 = arith.constant 0 : index
    %0 = vector.load %arg2[%c0, %c0_0, %c0_1] : memref<1x256x128xbf16, #tpu.memory_space<vmem>>, vector<1x256x128xbf16>
    %1 = vector.shape_cast %0 : vector<1x256x128xbf16> to vector<256x128xbf16>
    %c0_2 = arith.constant 0 : index
    %c0_3 = arith.constant 0 : index
    %2 = vector.load %arg3[%c0_2, %c0_3] : memref<128x1536xbf16, #tpu.memory_space<vmem>>, vector<128x512xbf16>
    %cst = arith.constant dense<0.000000e+00> : vector<256x512xf32>
    %3 = tpu.matmul %1, %2, %cst {dimension_numbers = #tpu.dot_dimension_numbers<[1], [0], [0], [1], [0, 0, 1, 1], [], []>} : vector<256x128xbf16>, vector<128x512xbf16>, vector<256x512xf32> -> vector<256x512xf32>
    %4 = arith.truncf %3 : vector<256x512xf32> to vector<256x512xbf16>
    %c0_4 = arith.constant 0 : index
    %c0_5 = arith.constant 0 : index
    %c0_6 = arith.constant 0 : index
    %5 = vector.load %arg4[%c0_4, %c0_5, %c0_6] : memref<1x256x512xbf16, #tpu.memory_space<vmem>>, vector<1x256x512xbf16>
    %6 = vector.shape_cast %5 : vector<1x256x512xbf16> to vector<256x512xbf16>
    %7 = vector.shape_cast %4 : vector<256x512xbf16> to vector<1x256x512xbf16>
    tpu.vector_store %arg4[%c0_4, %c0_5, %c0_6], %7 {strides = array<i32>} : memref<1x256x512xbf16, #tpu.memory_space<vmem>>, vector<1x256x512xbf16>,
    %c0_7 = arith.constant 0 : index
    %c512 = arith.constant 512 : index
    %8 = vector.load %arg3[%c0_7, %c512] : memref<128x1536xbf16, #tpu.memory_space<vmem>>, vector<128x512xbf16>
    %cst_8 = arith.constant dense<0.000000e+00> : vector<256x512xf32>
    %9 = tpu.matmul %1, %8, %cst_8 {dimension_numbers = #tpu.dot_dimension_numbers<[1], [0], [0], [1], [0, 0, 1, 1], [], []>} : vector<256x128xbf16>, vector<128x512xbf16>, vector<256x512xf32> -> vector<256x512xf32>
    %10 = arith.truncf %9 : vector<256x512xf32> to vector<256x512xbf16>
    %c0_9 = arith.constant 0 : index
    %c0_10 = arith.constant 0 : index
    %c0_11 = arith.constant 0 : index
    %11 = vector.load %arg5[%c0_9, %c0_10, %c0_11] : memref<1x256x512xbf16, #tpu.memory_space<vmem>>, vector<1x256x512xbf16>
    %12 = vector.shape_cast %11 : vector<1x256x512xbf16> to vector<256x512xbf16>
    %13 = vector.shape_cast %10 : vector<256x512xbf16> to vector<1x256x512xbf16>
    tpu.vector_store %arg5[%c0_9, %c0_10, %c0_11], %13 {strides = array<i32>} : memref<1x256x512xbf16, #tpu.memory_space<vmem>>, vector<1x256x512xbf16>,
    %c0_12 = arith.constant 0 : index
    %c1024 = arith.constant 1024 : index
    %14 = vector.load %arg3[%c0_12, %c1024] : memref<128x1536xbf16, #tpu.memory_space<vmem>>, vector<128x512xbf16>
    %cst_13 = arith.constant dense<0.000000e+00> : vector<256x512xf32>
    %15 = tpu.matmul %1, %14, %cst_13 {dimension_numbers = #tpu.dot_dimension_numbers<[1], [0], [0], [1], [0, 0, 1, 1], [], []>} : vector<256x128xbf16>, vector<128x512xbf16>, vector<256x512xf32> -> vector<256x512xf32>
    %16 = arith.truncf %15 : vector<256x512xf32> to vector<256x512xbf16>
    %c0_14 = arith.constant 0 : index
    %c0_15 = arith.constant 0 : index
    %c0_16 = arith.constant 0 : index
    %17 = vector.load %arg6[%c0_14, %c0_15, %c0_16] : memref<1x256x512xbf16, #tpu.memory_space<vmem>>, vector<1x256x512xbf16>
    %18 = vector.shape_cast %17 : vector<1x256x512xbf16> to vector<256x512xbf16>
    %19 = vector.shape_cast %16 : vector<256x512xbf16> to vector<1x256x512xbf16>
    tpu.vector_store %arg6[%c0_14, %c0_15, %c0_16], %19 {strides = array<i32>} : memref<1x256x512xbf16, #tpu.memory_space<vmem>>, vector<1x256x512xbf16>,
    return
  }
  func.func @transform_0(%arg0: i32, %arg1: i32) -> (i32, i32, i32) {
    %c0_i32 = arith.constant 0 : i32
    %c0_i32_0 = arith.constant 0 : i32
    return %arg0, %arg1, %c0_i32 : i32, i32, i32
  }
  func.func @transform_1(%arg0: i32, %arg1: i32) -> (i32, i32) {
    %c0_i32 = arith.constant 0 : i32
    %c0_i32_0 = arith.constant 0 : i32
    %c0_i32_1 = arith.constant 0 : i32
    return %c0_i32, %c0_i32_0 : i32, i32
  }
  func.func @transform_2(%arg0: i32, %arg1: i32) -> (i32, i32, i32) {
    %c0_i32 = arith.constant 0 : i32
    %c0_i32_0 = arith.constant 0 : i32
    return %arg0, %arg1, %c0_i32 : i32, i32, i32
  }
  func.func @transform_3(%arg0: i32, %arg1: i32) -> (i32, i32, i32) {
    %c0_i32 = arith.constant 0 : i32
    %c0_i32_0 = arith.constant 0 : i32
    return %arg0, %arg1, %c0_i32 : i32, i32, i32
  }
  func.func @transform_4(%arg0: i32, %arg1: i32) -> (i32, i32, i32) {
    %c0_i32 = arith.constant 0 : i32
    %c0_i32_0 = arith.constant 0 : i32
    return %arg0, %arg1, %c0_i32 : i32, i32, i32
  }
}

</mosaic_0001>

<bundles_post_ra>
// kernel: tpu_custom_call.1
= control target key start
LH: loop header
LB: loop body
LE: loop exit
PB: predicated region body
PF: predicated region fallthrough
CT: control target
= control target key end

     0   :  { %10 = vsyncpa [#allocation3], 0  ;;  %s5473_s0 = inlined_call_operand.hbm [shape: bf16[2,256,128], index: 0, kind: input, shape index: {}]   ;;  %s5474_s1 = inlined_call_operand.hbm [shape: bf16[128,1536], index: 1, kind: input, shape index: {}]   ;;  %s5475_s2 = inlined_call_operand.hbm [shape: bf16[2,256,512], index: 2, kind: output, shape index: {0}]   ;;  %s5476_s3 = inlined_call_operand.hbm [shape: bf16[2,256,512], index: 3, kind: output, shape index: {1}]   ;;  %s5477_s4 = inlined_call_operand.hbm [shape: bf16[2,256,512], index: 4, kind: output, shape index: {2}]  }
   0x1   :  { %12 = vsyncpa [#allocation3 + $0x1], 0 }
   0x2   :  { %13 = vsyncpa [#allocation6], 0 }
   0x3   :  { %14 = vsyncpa [#allocation4], 0 }
   0x4   :  { %16 = vsyncpa [#allocation4 + $0x1], 0 }
   0x5   :  { %17 = vsyncpa [#allocation9], 0 }
   0x6   :  { %19 = vsyncpa [#allocation9 + $0x1], 0  ;;  %s4731_s15 = smov 0   ;;  %s4733_s16 = smov 0  }
   0x7   :  { %s4735_s17 = smov 0   ;;  %s4737_s18 = smov 0  }
   0x8   :  { %s4739_s19 = smov 0   ;;  %s4741_s20 = smov 0  }
   0x9 LB: > { %s4762_s21 = sadd.s32 4294967295, %s4692_s20   ;;  %s5481_s22 = sadd.s32 4294967294, %s4692_s20   ;;  %s4692_s20 = sphi %s4741_s20, %s25_s20   ;;  %s4688_s19 = sphi %s4739_s19, %s5501_s19   ;;  %s4684_s18 = sphi %s4737_s18, %s5500_s18   ;;  %s4680_s17 = sphi %s4735_s17, %s5499_s17   ;;  %s4676_s16 = sphi %s4733_s16, %s5498_s16   ;;  %s4672_s15 = sphi %s4731_s15, %s5497_s15  }
   0xa   : > { %p59_p0 = scmp.ne.s32.totalorder %s4676_s16, %s4672_s15  ;;  %p5478_p1 = scmp.eq.s32.totalorder %s4762_s21, 0 }
   0xb   : > { %p112_p3 = scmp.eq.s32.totalorder %s5481_s22, 1  ;;  %p3713_p5 = scmp.ge.s32.totalorder %s4692_s20, 1 }
   0xc   : > { %p4773_p4 = por %p5478_p1, %p59_p0  ;;  %p175_p7 = scmp.lt.s32.totalorder %s4692_s20, 3 }
   0xd   : > { %p4778_p6 = por %p112_p3, %p59_p0  ;;  %s4694_s26 = smov [#allocation5]  }
   0xe   : > { %s5482_s23 = scalar_select %p4773_p4, 1, 0 }
   0xf   : > { %s5483_s24 = scalar_select %p4778_p6, 1, 0 }
  0x10   : > { %p4783_p8 = pnand %p3713_p5, %p175_p7  ;;  %s187_s27 = sshll.u32 %s4694_s26, 4  ;;  %s188_s27 = int_to_ptr.vmem [resolvable:$true] %s187_s27 }
  0x11   : > { %s37_s29 = sadd.s32 1, %s4688_s19  ;;  %s4488_s6 = scalar_lea.hbm %s5474_s1, 12288 }
  0x12   : > { %s5484_s25 = scalar_select %p4783_p8, 1, 0 }
  0x13   : > { %p4248_p9 = pneg %p4783_p8  ;;  %p4489_p12 = scmp.ne.s32.totalorder %s5474_s1, %s4488_s6 }
  0x14   : > { %p4495_p5 = scmp.lt.u32.totalorder %s4488_s6, %s5474_s1 }
  0x15   : > { %p4792_p11 = pnand %p4248_p9, %p5478_p1 }
  0x17   : > { %p4490_p13 = pneg %p4792_p11 }
  0x19   : > { %p4491_p0 = pnand %p4490_p13, %p4489_p12 }
  0x1b   : > { %p4492_p3 = pneg %p4491_p0 }
  0x1d   : > { %p4497_p7 = pnand %p4495_p5, %p4492_p3 }
  0x1f   : > { %4500 = shalt.err (!%p4497_p7)
}
  0x20   : > { %s4501_s11 = scalar_lea.vmem %s188_s27, 12288  ;;  %p4509_p2 = scmp.lt.s32.totalorder %s188_s27, %s188_s27 }
  0x21   : > { %p4502_p9 = scmp.ne.s32.totalorder %s188_s27, %s4501_s11  ;;  %p4510_p6 = scmp.lt.s32.totalorder %s4501_s11, %s4501_s11 }
  0x23   : > { %p4504_p10 = pnand %p4502_p9, %p4490_p13  ;;  %p4511_p4 = por %p4510_p6, %p4509_p2 }
  0x25   : > { %p4505_p1 = pneg %p4504_p10 }
  0x27   : > { %p4512_p8 = pnand %p4511_p4, %p4505_p1 }
  0x29   : > { %4515 = shalt.err (!%p4512_p8)
}
  0x2a   : > { %s4695_s12 = smov 768   ;;  %s4696_s13 = smov 48  }
  0x2b   : > { %4251 = dma.hbm_to_vmem [thread:$0]  (!%p4792_p11), %s5474_s1, 12288, %s188_s27, [#allocation6], %s4695_s12, %s4695_s12, %s4696_s13  }
  0x2c   : > { %p39_p1 = scmp.ge.s32.totalorder %s37_s29, 2  ;;  %s46_s30 = sadd.s32 1, %s4680_s17 }
  0x2d   : > { %p53_p2 = scmp.ne.s32.totalorder %s4680_s17, %s4676_s16  ;;  %p54_p4 = scmp.eq.s32.totalorder %s4692_s20, 0 }
  0x2e   : > { %s5503_s29 = smov (%p39_p1, %s37_s29), 0  ;;  %p5487_p8 = scmp.eq.s32.totalorder %s4762_s21, 1 }
  0x2f   : > { %p4819_p6 = por %p54_p4, %p53_p2  ;;  %s41_s28 = ssub.s32 %s4688_s19, %s5503_s29 }
  0x30   : > { %p4825_p10 = por %p5487_p8, %p53_p2  ;;  %p4267_p12 = scmp.lt.s32.totalorder %s4692_s20, 2 }
  0x31   : > { %p44_p11 = scmp.eq.s32.totalorder %s41_s28, 0  ;;  %s201_s27 = sand.u32 1, %s4680_s17  }
  0x32   : > { %s3716_s7 = sshll.u32 %s201_s27, 7  ;;  %s4040_s9 = sshll.u32 %s4688_s19, 11 }
  0x33   : > { %s4834_s8 = scalar_select %p44_p11, %s4680_s17, %s46_s30  }
  0x34   : > { %s4840_s12 = scalar_lea.hbm %s5473_s0, %s4040_s9  ;;  %s205_s13 = scalar_lea.vmem [#allocation2], %s3716_s7 }
  0x35   : > { %s214_s14 = sshll.u32 %s205_s13, 4  ;;  %p4846_p13 = pnand %p4267_p12, %p4819_p6  ;;  %s4842_s14 = int_to_ptr.vmem [resolvable:$true] %s214_s14 }
  0x36   : > { %s4850_s30 = scalar_lea.sflag [#allocation3], %s201_s27  ;;  %s4516_s28 = scalar_lea.hbm %s4840_s12, 2048 }
  0x37   : > { %p4517_p0 = scmp.ne.s32.totalorder %s4840_s12, %s4516_s28  ;;  %p4518_p3 = pneg %p4846_p13 }
  0x38   : > { %s4521_s5 = scalar_lea.hbm %s5473_s0, 4096  ;;  %p4522_p9 = scmp.lt.u32.totalorder %s4840_s12, %s5473_s0 }
  0x39   : > { %p4519_p5 = pnand %p4518_p3, %p4517_p0  ;;  %p4523_p1 = scmp.lt.u32.totalorder %s4521_s5, %s4516_s28 }
  0x3a   : > { %p4525_p4 = scmp.lt.u32.totalorder %s4516_s28, %s4840_s12 }
  0x3b   : > { %p4520_p7 = pneg %p4519_p5  ;;  %p4524_p2 = por %p4523_p1, %p4522_p9 }
  0x3d   : > { %p4526_p6 = por %p4525_p4, %p4524_p2 }
  0x3f   : > { %p4527_p8 = pnand %p4526_p6, %p4520_p7 }
  0x41   : > { %4530 = shalt.err (!%p4527_p8)
}
  0x42   : > { %s4531_s27 = scalar_lea.vmem %s4842_s14, 2048  ;;  %s4697_s13 = smov [#allocation2]  }
  0x43   : > { %p4532_p12 = scmp.ne.s32.totalorder %s4842_s14, %s4531_s27  ;;  %s4536_s7 = sshll.u32 %s4697_s13, 4  ;;  %s4537_s7 = int_to_ptr.vmem [resolvable:$false] %s4536_s7 }
  0x44   : > { %s4538_s9 = scalar_lea.vmem %s4537_s7, 4096  ;;  %p4539_p5 = scmp.lt.s32.totalorder %s4842_s14, %s4537_s7 }
  0x45   : > { %p4534_p11 = pnand %p4532_p12, %p4518_p3  ;;  %p4540_p9 = scmp.lt.s32.totalorder %s4538_s9, %s4531_s27 }
  0x47   : > { %p4535_p0 = pneg %p4534_p11  ;;  %p4541_p1 = por %p4540_p9, %p4539_p5 }
  0x49   : > { %p4542_p2 = pnand %p4541_p1, %p4535_p0 }
  0x4b   : > { %4545 = shalt.err (!%p4542_p2)
}
  0x4c   : > { %s4698_s28 = smov 64   ;;  %s4699_s5 = smov 4  }
  0x4d   : > { %4255 = dma.hbm_to_vmem [thread:$0]  (!%p4846_p13), %s4840_s12, 2048, %s4842_s14, %s4850_s30, %s4698_s28, %s4698_s28, %s4699_s5  }
  0x4e   : > { %p5490_p3 = scmp.ne.s32.totalorder %s5484_s25, 0 }
  0x4f   : > { %s4881_s10 = sand.u32 (!%p5490_p3), 1, %s4676_s16   ;;  %p5491_p7 = scmp.ne.s32.totalorder (!%p5490_p3), %s5482_s23, 0 }
  0x50   : > { %226 = sbr.rel (%p5490_p3) target bundleno = 732 (0x2dc), region = 28  ;;  %s3720_s11 = sshll.u32 (!%p5490_p3), %s4881_s10, 7 }
  0x51   : > { %s229_s27 = scalar_lea.sflag (!%p5490_p3), [#allocation3], %s4881_s10  ;;  %s4885_s13 = scalar_lea.vmem (!%p5490_p3), [#allocation2], %s3720_s11 }
  0x57   : > { %4655 = dma.done.wait (%p5491_p7), %s229_s27, 2048  }
  0x58   : > { %4657 = vsyncadd (%p5491_p7), %s229_s27, 4294965248  ;;  %p5492_p13 = scmp.eq.s32.totalorder %s4762_s21, 0 }
  0x5a   : > { %4659 = dma.done.wait (%p5492_p13), [#allocation6], 12288   ;;  %p5493_p4 = pmov %p5492_p13 }
  0x5b   : > { %v4700_v0 = vmov 0   ;;  %v4326_v1 = vld [vmem:[#allocation5 + $0x4] ss:$48 sps:$4 sm:$0xff]   ;;  %v4328_v2 = vld [vmem:[#allocation5 + $0xc] ss:$48 sps:$4 sm:$0xff]   ;;  %s5052_s23 = sshll.u32 %s4881_s10, 9 }
  0x5c   : > { %4661 = vsyncadd (%p5493_p4), [#allocation6], 4294955008  ;;  %628 = vmatprep.mubr.bf16.mxu0 %v4700_v0  ;;  %821 = vmatprep.mubr.bf16.mxu1 %v4700_v0  ;;  %v4330_v3 = vld [vmem:[#allocation5] ss:$48 sps:$4 sm:$0xff]   ;;  %v4331_v4 = vld [vmem:[#allocation5 + $0x8] ss:$48 sps:$4 sm:$0xff]  }
  0x5d   : > { %596 = vmatprep.subr.bf16.mxu0 %v4326_v1  ;;  %789 = vmatprep.subr.bf16.mxu1 %v4328_v2  ;;  %v4332_v5 = vld [vmem:[#allocation5 + $0x64] ss:$48 sps:$4 sm:$0xff]   ;;  %v4334_v6 = vld [vmem:[#allocation5 + $0x6c] ss:$48 sps:$4 sm:$0xff]   ;;  %v4336_v7 = vld [vmem:[#allocation5 + $0x60] ss:$48 sps:$4 sm:$0xff]  }
  0x5e   : > { %597 = vmatpush1.bf16.msra.mxu0 %v4330_v3  ;;  %790 = vmatpush1.bf16.msra.mxu1 %v4331_v4  ;;  %v4337_v8 = vld [vmem:[#allocation5 + $0x68] ss:$48 sps:$4 sm:$0xff]   ;;  %v4338_v9 = vld [vmem:[#allocation5 + $0xc4] ss:$48 sps:$4 sm:$0xff]   ;;  %v4340_v10 = vld [vmem:[#allocation5 + $0xcc] ss:$48 sps:$4 sm:$0xff]  }
  0x5f   : > { %598 = vmatprep.subr.bf16.mxu0 %v4332_v5  ;;  %791 = vmatprep.subr.bf16.mxu1 %v4334_v6  ;;  %v4342_v11 = vld [vmem:[#allocation5 + $0xc0] ss:$48 sps:$4 sm:$0xff]   ;;  %v4343_v12 = vld [vmem:[#allocation5 + $0xc8] ss:$48 sps:$4 sm:$0xff]   ;;  %v4344_v13 = vld [vmem:[#allocation5 + $0x124] ss:$48 sps:$4 sm:$0xff]  }
  0x60   : > { %v4346_v14 = vld [vmem:[#allocation5 + $0x12c] ss:$48 sps:$4 sm:$0xff]   ;;  %v4348_v15 = vld [vmem:[#allocation5 + $0x120] ss:$48 sps:$4 sm:$0xff]   ;;  %v4349_v16 = vld [vmem:[#allocation5 + $0x128] ss:$48 sps:$4 sm:$0xff]  }
  0x61   : > { %v4350_v17 = vld [vmem:[#allocation5 + $0x184] ss:$48 sps:$4 sm:$0xff]   ;;  %v4352_v18 = vld [vmem:[#allocation5 + $0x18c] ss:$48 sps:$4 sm:$0xff]   ;;  %v4354_v19 = vld [vmem:[#allocation5 + $0x180] ss:$48 sps:$4 sm:$0xff]  }
  0x62   : > { %599 = vmatpush1.bf16.msra.mxu0 %v4336_v7  ;;  %792 = vmatpush1.bf16.msra.mxu1 %v4337_v8  ;;  %v4355_v20 = vld [vmem:[#allocation5 + $0x188] ss:$48 sps:$4 sm:$0xff]   ;;  %v4356_v21 = vld [vmem:[#allocation5 + $0x1e4] ss:$48 sps:$4 sm:$0xff]   ;;  %v4358_v22 = vld [vmem:[#allocation5 + $0x1ec] ss:$48 sps:$4 sm:$0xff]  }
  0x63   : > { %600 = vmatprep.subr.bf16.mxu0 %v4338_v9  ;;  %793 = vmatprep.subr.bf16.mxu1 %v4340_v10  ;;  %v4360_v23 = vld [vmem:[#allocation5 + $0x1e0] ss:$48 sps:$4 sm:$0xff]   ;;  %v4361_v24 = vld [vmem:[#allocation5 + $0x1e8] ss:$48 sps:$4 sm:$0xff]   ;;  %v4362_v25 = vld [vmem:[#allocation5 + $0x244] ss:$48 sps:$4 sm:$0xff]  }
  0x64   : > { %v4364_v26 = vld [vmem:[#allocation5 + $0x24c] ss:$48 sps:$4 sm:$0xff]   ;;  %v4366_v27 = vld [vmem:[#allocation5 + $0x240] ss:$48 sps:$4 sm:$0xff]   ;;  %v4367_v28 = vld [vmem:[#allocation5 + $0x248] ss:$48 sps:$4 sm:$0xff]  }
  0x65   : > { %v4368_v29 = vld [vmem:[#allocation5 + $0x2a4] ss:$48 sps:$4 sm:$0xff]   ;;  %v4370_v30 = vld [vmem:[#allocation5 + $0x2ac] ss:$48 sps:$4 sm:$0xff]   ;;  %v4372_v31 = vld [vmem:[#allocation5 + $0x2a0] ss:$48 sps:$4 sm:$0xff]  }
  0x66   : > { %601 = vmatpush1.bf16.msra.mxu0 %v4342_v11  ;;  %794 = vmatpush1.bf16.msra.mxu1 %v4343_v12  ;;  %v4373_v32 = vld [vmem:[#allocation5 + $0x2a8] ss:$48 sps:$4 sm:$0xff]   ;;  %v4377_v33 = vld [vmem:[#allocation5 + $0x14] ss:$48 sps:$4 sm:$0xff]   ;;  %v4380_v34 = vld [vmem:[#allocation5 + $0x1c] ss:$48 sps:$4 sm:$0xff]  }
  0x67   : > { %602 = vmatprep.subr.bf16.mxu0 %v4344_v13  ;;  %795 = vmatprep.subr.bf16.mxu1 %v4346_v14  ;;  %v4898_v35 = vld [vmem:[%s4885_s13] sm:$0xff]   ;;  %v4378_v37 = vld [vmem:[#allocation5 + $0x18] ss:$48 sps:$4 sm:$0xff]   ;;  %v4388_v39 = vld [vmem:[#allocation5 + $0x7c] ss:$48 sps:$4 sm:$0xff]   ;;  %s5057_s25 = scalar_lea.vmem [#allocation7], %s5052_s23 }
  0x68   : > { %v4375_v36 = vld [vmem:[#allocation5 + $0x10] ss:$48 sps:$4 sm:$0xff]   ;;  %v4385_v38 = vld [vmem:[#allocation5 + $0x74] ss:$48 sps:$4 sm:$0xff]   ;;  %v4386_v41 = vld [vmem:[#allocation5 + $0x78] ss:$48 sps:$4 sm:$0xff]  }
  0x69   : > { %v4383_v40 = vld [vmem:[#allocation5 + $0x70] ss:$48 sps:$4 sm:$0xff]   ;;  %v4393_v42 = vld [vmem:[#allocation5 + $0xd4] ss:$48 sps:$4 sm:$0xff]   ;;  %v4396_v43 = vld [vmem:[#allocation5 + $0xdc] ss:$48 sps:$4 sm:$0xff]  }
  0x6a   : > { %603 = vmatpush1.bf16.msra.mxu0 %v4348_v15  ;;  %796 = vmatpush1.bf16.msra.mxu1 %v4349_v16  ;;  %v4905_v44 = vld [vmem:[%s4885_s13 + $0x8] sm:$0xff]   ;;  %v4391_v45 = vld [vmem:[#allocation5 + $0xd0] ss:$48 sps:$4 sm:$0xff]   ;;  %v4401_v47 = vld [vmem:[#allocation5 + $0x134] ss:$48 sps:$4 sm:$0xff]   ;;  %s5188_s12 = scalar_lea.vmem [#allocation8], %s5052_s23 }
  0x6b   : > { %604 = vmatprep.subr.bf16.mxu0 %v4350_v17  ;;  %797 = vmatprep.subr.bf16.mxu1 %v4352_v18  ;;  %v4394_v46 = vld [vmem:[#allocation5 + $0xd8] ss:$48 sps:$4 sm:$0xff]   ;;  %v4404_v48 = vld [vmem:[#allocation5 + $0x13c] ss:$48 sps:$4 sm:$0xff]   ;;  %v4399_v49 = vld [vmem:[#allocation5 + $0x130] ss:$48 sps:$4 sm:$0xff]  }
  0x6c   : > { %v4912_v50 = vld [vmem:[%s4885_s13 + $0x10] sm:$0xff]   ;;  %v4402_v51 = vld [vmem:[#allocation5 + $0x138] ss:$48 sps:$4 sm:$0xff]   ;;  %v4412_v53 = vld [vmem:[#allocation5 + $0x19c] ss:$48 sps:$4 sm:$0xff]   ;;  %s3487_s14 = sand.u32 1, %s4762_s21  }
  0x6d   : > { %v4409_v52 = vld [vmem:[#allocation5 + $0x194] ss:$48 sps:$4 sm:$0xff]   ;;  %v4407_v54 = vld [vmem:[#allocation5 + $0x190] ss:$48 sps:$4 sm:$0xff]   ;;  %v4410_v55 = vld [vmem:[#allocation5 + $0x198] ss:$48 sps:$4 sm:$0xff]  }
  0x6e   : > { %605 = vmatpush1.bf16.msra.mxu0 %v4354_v19  ;;  %798 = vmatpush1.bf16.msra.mxu1 %v4355_v20  ;;  %v4417_v56 = vld [vmem:[#allocation5 + $0x1f4] ss:$48 sps:$4 sm:$0xff]   ;;  %v4420_v57 = vld [vmem:[#allocation5 + $0x1fc] ss:$48 sps:$4 sm:$0xff]   ;;  %v4415_v58 = vld [vmem:[#allocation5 + $0x1f0] ss:$48 sps:$4 sm:$0xff]  }
  0x6f   : > { %606 = vmatprep.subr.bf16.mxu0 %v4356_v21  ;;  %799 = vmatprep.subr.bf16.mxu1 %v4358_v22  ;;  %v4418_v59 = vld [vmem:[#allocation5 + $0x1f8] ss:$48 sps:$4 sm:$0xff]   ;;  %v4425_v60 = vld [vmem:[#allocation5 + $0x254] ss:$48 sps:$4 sm:$0xff]   ;;  %v4428_v61 = vld [vmem:[#allocation5 + $0x25c] ss:$48 sps:$4 sm:$0xff]  }
  0x70   : > { %v4919_v62 = vld [vmem:[%s4885_s13 + $0x18] sm:$0xff]   ;;  %v4423_v63 = vld [vmem:[#allocation5 + $0x250] ss:$48 sps:$4 sm:$0xff]   ;;  %v4433_v2 = vld [vmem:[#allocation5 + $0x2b4] ss:$48 sps:$4 sm:$0xff]   ;;  %s5271_s26 = sshll.u32 %s4684_s18, 13 }
  0x71   : > { %v4426_v1 = vld [vmem:[#allocation5 + $0x258] ss:$48 sps:$4 sm:$0xff]   ;;  %v4436_v3 = vld [vmem:[#allocation5 + $0x2bc] ss:$48 sps:$4 sm:$0xff]   ;;  %v4431_v4 = vld [vmem:[#allocation5 + $0x2b0] ss:$48 sps:$4 sm:$0xff]   ;;  %s5279_s9 = scalar_lea.hbm %s5476_s3, %s5271_s26 }
  0x72   : > { %607 = vmatpush1.bf16.msra.mxu0 %v4360_v23  ;;  %800 = vmatpush1.bf16.msra.mxu1 %v4361_v24  ;;  %v4434_v5 = vld [vmem:[#allocation5 + $0x2b8] ss:$48 sps:$4 sm:$0xff]   ;;  %v4440_v6 = vld [vmem:[#allocation5 + $0x24] ss:$48 sps:$4 sm:$0xff]   ;;  %v4443_v7 = vld [vmem:[#allocation5 + $0x2c] ss:$48 sps:$4 sm:$0xff]  }
  0x73   : > { %608 = vmatprep.subr.bf16.mxu0 %v4362_v25  ;;  %801 = vmatprep.subr.bf16.mxu1 %v4364_v26  ;;  %v4926_v8 = vld [vmem:[%s4885_s13 + $0x20] sm:$0xff]   ;;  %v4933_v9 = vld [vmem:[%s4885_s13 + $0x28] sm:$0xff]   ;;  %v4940_v10 = vld [vmem:[%s4885_s13 + $0x30] sm:$0xff]   ;;  %s3528_s28 = sshll.u32 %s5188_s12, 4  ;;  %s5284_s18 = scalar_lea.sflag [#allocation9], %s3487_s14  ;;  %s5282_s28 = int_to_ptr.vmem [resolvable:$true] %s3528_s28 }
  0x74   : > { %v4947_v11 = vld [vmem:[%s4885_s13 + $0x38] sm:$0xff]   ;;  %v4954_v12 = vld [vmem:[%s4885_s13 + $0x40] sm:$0xff]   ;;  %v4961_v13 = vld [vmem:[%s4885_s13 + $0x48] sm:$0xff]   ;;  %s4546_s21 = scalar_lea.vmem %s5282_s28, 8192  ;;  %s4701_s5 = smov [#allocation8]  }
  0x75   : > { %v4968_v14 = vld [vmem:[%s4885_s13 + $0x50] sm:$0xff]   ;;  %v4975_v15 = vld [vmem:[%s4885_s13 + $0x58] sm:$0xff]   ;;  %v4982_v16 = vld [vmem:[%s4885_s13 + $0x60] sm:$0xff]   ;;  %p4547_p6 = scmp.ne.s32.totalorder %s5282_s28, %s4546_s21  ;;  %s4550_s11 = sshll.u32 %s4701_s5, 4  ;;  %s4551_s11 = int_to_ptr.vmem [resolvable:$false] %s4550_s11 }
  0x76   : > { %609 = vmatpush1.bf16.msra.mxu0 %v4366_v27  ;;  %802 = vmatpush1.bf16.msra.mxu1 %v4367_v28  ;;  %v4989_v17 = vld [vmem:[%s4885_s13 + $0x68] sm:$0xff]   ;;  %v4996_v18 = vld [vmem:[%s4885_s13 + $0x70] sm:$0xff]   ;;  %v5003_v19 = vld [vmem:[%s4885_s13 + $0x78] sm:$0xff]   ;;  %s4552_s27 = scalar_lea.vmem %s4551_s11, 16384  ;;  %p4553_p11 = scmp.lt.s32.totalorder %s5282_s28, %s4551_s11 }
  0x77   : > { %610 = vmatprep.subr.bf16.mxu0 %v4368_v29  ;;  %803 = vmatprep.subr.bf16.mxu1 %v4370_v30  ;;  %v4438_v20 = vld [vmem:[#allocation5 + $0x20] ss:$48 sps:$4 sm:$0xff]   ;;  %v4441_v21 = vld [vmem:[#allocation5 + $0x28] ss:$48 sps:$4 sm:$0xff]   ;;  %v4446_v22 = vld [vmem:[#allocation5 + $0x84] ss:$48 sps:$4 sm:$0xff]   ;;  %p4548_p8 = pnand %p4547_p6, %p4825_p10  ;;  %p4554_p0 = scmp.lt.s32.totalorder %s4552_s27, %s4546_s21 }
  0x78   : > { %v4449_v23 = vld [vmem:[#allocation5 + $0x8c] ss:$48 sps:$4 sm:$0xff]   ;;  %v4444_v24 = vld [vmem:[#allocation5 + $0x80] ss:$48 sps:$4 sm:$0xff]   ;;  %v4447_v25 = vld [vmem:[#allocation5 + $0x88] ss:$48 sps:$4 sm:$0xff]  }
  0x79   : > { %v4452_v26 = vld [vmem:[#allocation5 + $0xe4] ss:$48 sps:$4 sm:$0xff]   ;;  %v4455_v27 = vld [vmem:[#allocation5 + $0xec] ss:$48 sps:$4 sm:$0xff]   ;;  %v4450_v28 = vld [vmem:[#allocation5 + $0xe0] ss:$48 sps:$4 sm:$0xff]   ;;  %p4549_p12 = pneg %p4548_p8  ;;  %p4555_p5 = por %p4554_p0, %p4553_p11 }
  0x7a   : > { %611 = vmatpush1.bf16.msra.mxu0 %v4372_v31  ;;  %804 = vmatpush1.bf16.msra.mxu1 %v4373_v32  ;;  %v4453_v29 = vld [vmem:[#allocation5 + $0xe8] ss:$48 sps:$4 sm:$0xff]   ;;  %v4458_v30 = vld [vmem:[#allocation5 + $0x144] ss:$48 sps:$4 sm:$0xff]   ;;  %v4461_v31 = vld [vmem:[#allocation5 + $0x14c] ss:$48 sps:$4 sm:$0xff]  }
  0x7b   : > { %1622 = vmatprep.subr.bf16.mxu0 %v4377_v33  ;;  %1815 = vmatprep.subr.bf16.mxu1 %v4380_v34  ;;  %v4456_v32 = vld [vmem:[#allocation5 + $0x140] ss:$48 sps:$4 sm:$0xff]   ;;  %v4459_v33 = vld [vmem:[#allocation5 + $0x148] ss:$48 sps:$4 sm:$0xff]   ;;  %v4464_v34 = vld [vmem:[#allocation5 + $0x1a4] ss:$48 sps:$4 sm:$0xff]   ;;  %p4556_p9 = pnand %p4555_p5, %p4549_p12 }
  0x7d   : > { %629 = vmatmul.mubr.bf16.vlgmr.msra.gmra.mrb[0].mxu0 %v4898_v35  ;;  %822 = vmatmul.mubr.bf16.vlgmr.msra.gmra.mrb[0].mxu1 %v4898_v35 }
  0x7e   : > { %1623 = vmatpush1.bf16.msra.mxu0 %v4375_v36  ;;  %1816 = vmatpush1.bf16.msra.mxu1 %v4378_v37  ;;  %v4467_v36 = vld [vmem:[#allocation5 + $0x1ac] ss:$48 sps:$4 sm:$0xff]   ;;  %v4462_v37 = vld [vmem:[#allocation5 + $0x1a0] ss:$48 sps:$4 sm:$0xff]  }
  0x7f   : > { %638 = vmatprep.mubr.bf16.mxu0 %v4700_v0  ;;  %831 = vmatprep.mubr.bf16.mxu1 %v4700_v0 }
  0x80   : > { %1624 = vmatprep.subr.bf16.mxu0 %v4385_v38  ;;  %1817 = vmatprep.subr.bf16.mxu1 %v4388_v39  ;;  %v4465_v38 = vld [vmem:[#allocation5 + $0x1a8] ss:$48 sps:$4 sm:$0xff]   ;;  %v4470_v39 = vld [vmem:[#allocation5 + $0x204] ss:$48 sps:$4 sm:$0xff]  }
  0x82   : > { %1625 = vmatpush1.bf16.msra.mxu0 %v4383_v40  ;;  %1818 = vmatpush1.bf16.msra.mxu1 %v4386_v41  ;;  %v4473_v40 = vld [vmem:[#allocation5 + $0x20c] ss:$48 sps:$4 sm:$0xff]   ;;  %v4468_v41 = vld [vmem:[#allocation5 + $0x200] ss:$48 sps:$4 sm:$0xff]  }
  0x83   : > { %1626 = vmatprep.subr.bf16.mxu0 %v4393_v42  ;;  %1819 = vmatprep.subr.bf16.mxu1 %v4396_v43  ;;  %v4471_v42 = vld [vmem:[#allocation5 + $0x208] ss:$48 sps:$4 sm:$0xff]   ;;  %v4476_v43 = vld [vmem:[#allocation5 + $0x264] ss:$48 sps:$4 sm:$0xff]  }
  0x85   : > { %639 = vmatmul.mubr.bf16.gmra.mrb[4].mxu0 %v4905_v44  ;;  %832 = vmatmul.mubr.bf16.gmra.mrb[4].mxu1 %v4905_v44 }
  0x86   : > { %648 = vmatprep.mubr.bf16.mxu0 %v4700_v0  ;;  %841 = vmatprep.mubr.bf16.mxu1 %v4700_v0 }
  0x87   : > { %1627 = vmatpush1.bf16.msra.mxu0 %v4391_v45  ;;  %1820 = vmatpush1.bf16.msra.mxu1 %v4394_v46  ;;  %v4479_v45 = vld [vmem:[#allocation5 + $0x26c] ss:$48 sps:$4 sm:$0xff]   ;;  %v4474_v46 = vld [vmem:[#allocation5 + $0x260] ss:$48 sps:$4 sm:$0xff]  }
  0x88   : > { %1628 = vmatprep.subr.bf16.mxu0 %v4401_v47  ;;  %1821 = vmatprep.subr.bf16.mxu1 %v4404_v48  ;;  %v4477_v47 = vld [vmem:[#allocation5 + $0x268] ss:$48 sps:$4 sm:$0xff]   ;;  %v4482_v48 = vld [vmem:[#allocation5 + $0x2c4] ss:$48 sps:$4 sm:$0xff]  }
  0x8b   : > { %1629 = vmatpush1.bf16.msra.mxu0 %v4399_v49  ;;  %1822 = vmatpush1.bf16.msra.mxu1 %v4402_v51  ;;  %v4485_v49 = vld [vmem:[#allocation5 + $0x2cc] ss:$48 sps:$4 sm:$0xff]   ;;  %v4480_v51 = vld [vmem:[#allocation5 + $0x2c0] ss:$48 sps:$4 sm:$0xff]  }
  0x8c   : > { %1630 = vmatprep.subr.bf16.mxu0 %v4409_v52  ;;  %1823 = vmatprep.subr.bf16.mxu1 %v4412_v53  ;;  %v4483_v52 = vld [vmem:[#allocation5 + $0x2c8] ss:$48 sps:$4 sm:$0xff]  }
  0x8d   : > { %649 = vmatmul.mubr.bf16.gmra.mrb[8].mxu0 %v4912_v50  ;;  %842 = vmatmul.mubr.bf16.gmra.mrb[8].mxu1 %v4912_v50 }
  0x8e   : > { %658 = vmatprep.mubr.bf16.mxu0 %v4700_v0  ;;  %851 = vmatprep.mubr.bf16.mxu1 %v4700_v0 }
  0x8f   : > { %1631 = vmatpush1.bf16.msra.mxu0 %v4407_v54  ;;  %1824 = vmatpush1.bf16.msra.mxu1 %v4410_v55 }
  0x90   : > { %1632 = vmatprep.subr.bf16.mxu0 %v4417_v56  ;;  %1825 = vmatprep.subr.bf16.mxu1 %v4420_v57 }
  0x93   : > { %1633 = vmatpush1.bf16.msra.mxu0 %v4415_v58  ;;  %1826 = vmatpush1.bf16.msra.mxu1 %v4418_v59 }
  0x94   : > { %1634 = vmatprep.subr.bf16.mxu0 %v4425_v60  ;;  %1827 = vmatprep.subr.bf16.mxu1 %v4428_v61 }
  0x95   : > { %659 = vmatmul.mubr.bf16.gmra.mrb[12].mxu0 %v4919_v62  ;;  %852 = vmatmul.mubr.bf16.gmra.mrb[12].mxu1 %v4919_v62 }
  0x96   : > { %668 = vmatprep.mubr.bf16.mxu0 %v4700_v0  ;;  %861 = vmatprep.mubr.bf16.mxu1 %v4700_v0 }
  0x97   : > { %1635 = vmatpush1.bf16.msra.mxu0 %v4423_v63  ;;  %1828 = vmatpush1.bf16.msra.mxu1 %v4426_v1 }
  0x98   : > { %1636 = vmatprep.subr.bf16.mxu0 %v4433_v2  ;;  %1829 = vmatprep.subr.bf16.mxu1 %v4436_v3 }
  0x9b   : > { %1637 = vmatpush1.bf16.msra.mxu0 %v4431_v4  ;;  %1830 = vmatpush1.bf16.msra.mxu1 %v4434_v5 }
  0x9c   : > { %2648 = vmatprep.subr.bf16.mxu0 %v4440_v6  ;;  %2841 = vmatprep.subr.bf16.mxu1 %v4443_v7 }
  0x9d   : > { %669 = vmatmul.mubr.bf16.gmra.mrb[16].mxu0 %v4926_v8  ;;  %862 = vmatmul.mubr.bf16.gmra.mrb[16].mxu1 %v4926_v8 }
  0x9e   : > { %678 = vmatprep.mubr.bf16.mxu0 %v4700_v0  ;;  %871 = vmatprep.mubr.bf16.mxu1 %v4700_v0 }
  0xa5   : > { %679 = vmatmul.mubr.bf16.gmra.mrb[20].mxu0 %v4933_v9  ;;  %872 = vmatmul.mubr.bf16.gmra.mrb[20].mxu1 %v4933_v9 }
  0xa6   : > { %688 = vmatprep.mubr.bf16.mxu0 %v4700_v0  ;;  %881 = vmatprep.mubr.bf16.mxu1 %v4700_v0 }
  0xad   : > { %689 = vmatmul.mubr.bf16.gmra.mrb[24].mxu0 %v4940_v10  ;;  %882 = vmatmul.mubr.bf16.gmra.mrb[24].mxu1 %v4940_v10 }
  0xae   : > { %698 = vmatprep.mubr.bf16.mxu0 %v4700_v0  ;;  %891 = vmatprep.mubr.bf16.mxu1 %v4700_v0 }
  0xb5   : > { %699 = vmatmul.mubr.bf16.gmra.mrb[28].mxu0 %v4947_v11  ;;  %892 = vmatmul.mubr.bf16.gmra.mrb[28].mxu1 %v4947_v11 }
  0xb6   : > { %708 = vmatprep.mubr.bf16.mxu0 %v4700_v0  ;;  %901 = vmatprep.mubr.bf16.mxu1 %v4700_v0 }
  0xbd   : > { %709 = vmatmul.mubr.bf16.gmra.mrb[32].mxu0 %v4954_v12  ;;  %902 = vmatmul.mubr.bf16.gmra.mrb[32].mxu1 %v4954_v12 }
  0xbe   : > { %718 = vmatprep.mubr.bf16.mxu0 %v4700_v0  ;;  %911 = vmatprep.mubr.bf16.mxu1 %v4700_v0 }
  0xc5   : > { %719 = vmatmul.mubr.bf16.gmra.mrb[36].mxu0 %v4961_v13  ;;  %912 = vmatmul.mubr.bf16.gmra.mrb[36].mxu1 %v4961_v13 }
  0xc6   : > { %728 = vmatprep.mubr.bf16.mxu0 %v4700_v0  ;;  %921 = vmatprep.mubr.bf16.mxu1 %v4700_v0 }
  0xcd   : > { %729 = vmatmul.mubr.bf16.gmra.mrb[40].mxu0 %v4968_v14  ;;  %922 = vmatmul.mubr.bf16.gmra.mrb[40].mxu1 %v4968_v14 }
  0xce   : > { %738 = vmatprep.mubr.bf16.mxu0 %v4700_v0  ;;  %931 = vmatprep.mubr.bf16.mxu1 %v4700_v0 }
  0xd5   : > { %739 = vmatmul.mubr.bf16.gmra.mrb[44].mxu0 %v4975_v15  ;;  %932 = vmatmul.mubr.bf16.gmra.mrb[44].mxu1 %v4975_v15 }
  0xd6   : > { %748 = vmatprep.mubr.bf16.mxu0 %v4700_v0  ;;  %941 = vmatprep.mubr.bf16.mxu1 %v4700_v0 }
  0xdd   : > { %749 = vmatmul.mubr.bf16.gmra.mrb[48].mxu0 %v4982_v16  ;;  %942 = vmatmul.mubr.bf16.gmra.mrb[48].mxu1 %v4982_v16 }
  0xde   : > { %758 = vmatprep.mubr.bf16.mxu0 %v4700_v0  ;;  %951 = vmatprep.mubr.bf16.mxu1 %v4700_v0 }
  0xe5   : > { %759 = vmatmul.mubr.bf16.gmra.mrb[52].mxu0 %v4989_v17  ;;  %952 = vmatmul.mubr.bf16.gmra.mrb[52].mxu1 %v4989_v17 }
  0xe6   : > { %768 = vmatprep.mubr.bf16.mxu0 %v4700_v0  ;;  %961 = vmatprep.mubr.bf16.mxu1 %v4700_v0 }
  0xed   : > { %769 = vmatmul.mubr.bf16.gmra.mrb[56].mxu0 %v4996_v18  ;;  %962 = vmatmul.mubr.bf16.gmra.mrb[56].mxu1 %v4996_v18 }
  0xee   : > { %778 = vmatprep.mubr.bf16.mxu0 %v4700_v0  ;;  %971 = vmatprep.mubr.bf16.mxu1 %v4700_v0 }
  0xf5   : > { %779 = vmatmul.mubr.bf16.gmra.mrb[60].mxu0 %v5003_v19  ;;  %972 = vmatmul.mubr.bf16.gmra.mrb[60].mxu1 %v5003_v19 }
  0xf6   : > { %1654 = vmatprep.mubr.bf16.mxu0 %v4700_v0  ;;  %1847 = vmatprep.mubr.bf16.mxu1 %v4700_v0 }
  0xfd   : > { %1655 = vmatmul.mubr.bf16.vlgmr.msra.gmra.mrb[64].mxu0 %v4898_v35  ;;  %1848 = vmatmul.mubr.bf16.vlgmr.msra.gmra.mrb[64].mxu1 %v4898_v35 }
  0xfe   : > { %2649 = vmatpush1.bf16.msra.mxu0 %v4438_v20  ;;  %2842 = vmatpush1.bf16.msra.mxu1 %v4441_v21 }
  0xff   : > { %1664 = vmatprep.mubr.bf16.mxu0 %v4700_v0  ;;  %1857 = vmatprep.mubr.bf16.mxu1 %v4700_v0 }
 0x100   : > { %2650 = vmatprep.subr.bf16.mxu0 %v4446_v22  ;;  %2843 = vmatprep.subr.bf16.mxu1 %v4449_v23 }
 0x102   : > { %2651 = vmatpush1.bf16.msra.mxu0 %v4444_v24  ;;  %2844 = vmatpush1.bf16.msra.mxu1 %v4447_v25 }
 0x103   : > { %2652 = vmatprep.subr.bf16.mxu0 %v4452_v26  ;;  %2845 = vmatprep.subr.bf16.mxu1 %v4455_v27 }
 0x105   : > { %1665 = vmatmul.mubr.bf16.gmra.mrb[68].mxu0 %v4905_v44  ;;  %1858 = vmatmul.mubr.bf16.gmra.mrb[68].mxu1 %v4905_v44 }
 0x106   : > { %1674 = vmatprep.mubr.bf16.mxu0 %v4700_v0  ;;  %1867 = vmatprep.mubr.bf16.mxu1 %v4700_v0 }
 0x107   : > { %2653 = vmatpush1.bf16.msra.mxu0 %v4450_v28  ;;  %2846 = vmatpush1.bf16.msra.mxu1 %v4453_v29 }
 0x108   : > { %2654 = vmatprep.subr.bf16.mxu0 %v4458_v30  ;;  %2847 = vmatprep.subr.bf16.mxu1 %v4461_v31 }
 0x10b   : > { %2655 = vmatpush1.bf16.msra.mxu0 %v4456_v32  ;;  %2848 = vmatpush1.bf16.msra.mxu1 %v4459_v33 }
 0x10c   : > { %2656 = vmatprep.subr.bf16.mxu0 %v4464_v34  ;;  %2849 = vmatprep.subr.bf16.mxu1 %v4467_v36 }
 0x10d   : > { %1675 = vmatmul.mubr.bf16.gmra.mrb[72].mxu0 %v4912_v50  ;;  %1868 = vmatmul.mubr.bf16.gmra.mrb[72].mxu1 %v4912_v50 }
 0x10e   : > { %1684 = vmatprep.mubr.bf16.mxu0 %v4700_v0  ;;  %1877 = vmatprep.mubr.bf16.mxu1 %v4700_v0 }
 0x10f   : > { %2657 = vmatpush1.bf16.msra.mxu0 %v4462_v37  ;;  %2850 = vmatpush1.bf16.msra.mxu1 %v4465_v38 }
 0x110   : > { %2658 = vmatprep.subr.bf16.mxu0 %v4470_v39  ;;  %2851 = vmatprep.subr.bf16.mxu1 %v4473_v40 }
 0x113   : > { %2659 = vmatpush1.bf16.msra.mxu0 %v4468_v41  ;;  %2852 = vmatpush1.bf16.msra.mxu1 %v4471_v42 }
 0x114   : > { %2660 = vmatprep.subr.bf16.mxu0 %v4476_v43  ;;  %2853 = vmatprep.subr.bf16.mxu1 %v4479_v45 }
 0x115   : > { %1685 = vmatmul.mubr.bf16.gmra.mrb[76].mxu0 %v4919_v62  ;;  %1878 = vmatmul.mubr.bf16.gmra.mrb[76].mxu1 %v4919_v62 }
 0x116   : > { %1694 = vmatprep.mubr.bf16.mxu0 %v4700_v0  ;;  %1887 = vmatprep.mubr.bf16.mxu1 %v4700_v0 }
 0x117   : > { %2661 = vmatpush1.bf16.msra.mxu0 %v4474_v46  ;;  %2854 = vmatpush1.bf16.msra.mxu1 %v4477_v47 }
 0x118   : > { %2662 = vmatprep.subr.bf16.mxu0 %v4482_v48  ;;  %2855 = vmatprep.subr.bf16.mxu1 %v4485_v49 }
 0x11b   : > { %2663 = vmatpush1.bf16.msra.mxu0 %v4480_v51  ;;  %2856 = vmatpush1.bf16.msra.mxu1 %v4483_v52 }
 0x11d   : > { %1695 = vmatmul.mubr.bf16.gmra.mrb[80].mxu0 %v4926_v8  ;;  %1888 = vmatmul.mubr.bf16.gmra.mrb[80].mxu1 %v4926_v8 }
 0x11e   : > { %1704 = vmatprep.mubr.bf16.mxu0 %v4700_v0  ;;  %1897 = vmatprep.mubr.bf16.mxu1 %v4700_v0 }
 0x125   : > { %1705 = vmatmul.mubr.bf16.gmra.mrb[84].mxu0 %v4933_v9  ;;  %1898 = vmatmul.mubr.bf16.gmra.mrb[84].mxu1 %v4933_v9 }
 0x126   : > { %1714 = vmatprep.mubr.bf16.mxu0 %v4700_v0  ;;  %1907 = vmatprep.mubr.bf16.mxu1 %v4700_v0 }
 0x12d   : > { %1715 = vmatmul.mubr.bf16.gmra.mrb[88].mxu0 %v4940_v10  ;;  %1908 = vmatmul.mubr.bf16.gmra.mrb[88].mxu1 %v4940_v10 }
 0x12e   : > { %1724 = vmatprep.mubr.bf16.mxu0 %v4700_v0  ;;  %1917 = vmatprep.mubr.bf16.mxu1 %v4700_v0 }
 0x135   : > { %1725 = vmatmul.mubr.bf16.gmra.mrb[92].mxu0 %v4947_v11  ;;  %1918 = vmatmul.mubr.bf16.gmra.mrb[92].mxu1 %v4947_v11 }
 0x136   : > { %1734 = vmatprep.mubr.bf16.mxu0 %v4700_v0  ;;  %1927 = vmatprep.mubr.bf16.mxu1 %v4700_v0 }
 0x13d   : > { %1735 = vmatmul.mubr.bf16.gmra.mrb[96].mxu0 %v4954_v12  ;;  %1928 = vmatmul.mubr.bf16.gmra.mrb[96].mxu1 %v4954_v12 }
 0x13e   : > { %1744 = vmatprep.mubr.bf16.mxu0 %v4700_v0  ;;  %1937 = vmatprep.mubr.bf16.mxu1 %v4700_v0 }
 0x145   : > { %1745 = vmatmul.mubr.bf16.gmra.mrb[100].mxu0 %v4961_v13  ;;  %1938 = vmatmul.mubr.bf16.gmra.mrb[100].mxu1 %v4961_v13 }
 0x146   : > { %1754 = vmatprep.mubr.bf16.mxu0 %v4700_v0  ;;  %1947 = vmatprep.mubr.bf16.mxu1 %v4700_v0 }
 0x14d   : > { %1755 = vmatmul.mubr.bf16.gmra.mrb[104].mxu0 %v4968_v14  ;;  %1948 = vmatmul.mubr.bf16.gmra.mrb[104].mxu1 %v4968_v14 }
 0x14e   : > { %1764 = vmatprep.mubr.bf16.mxu0 %v4700_v0  ;;  %1957 = vmatprep.mubr.bf16.mxu1 %v4700_v0 }
 0x150   : > { %v630_v53 = vpop.f32.mrb[0].mxu0  ;;  %v823_v54 = vpop.f32.mrb[0].mxu1 }
 0x151   : > { %v632_v55 = vpop.f32.mrb[1].mxu0  ;;  %v825_v56 = vpop.f32.mrb[1].mxu1 }
 0x152   : > { %v4041_v57 = vpack.c.bf16 %v632_v55, %v630_v53  ;;  %v4042_v58 = vpack.c.bf16 %v825_v56, %v823_v54  ;;  %v634_v59 = vpop.f32.mrb[2].mxu0  ;;  %v827_v60 = vpop.f32.mrb[2].mxu1 }
 0x153   : > { %v636_v61 = vpop.f32.mrb[3].mxu0  ;;  %v829_v63 = vpop.f32.mrb[3].mxu1 }
 0x154   : > { %1366 = vst [vmem:[%s5057_s25] sm:$0xff] %v4041_v57  ;;  %1367 = vst [vmem:[%s5057_s25 + $0x8] sm:$0xff] %v4042_v58  ;;  %v4043_v1 = vpack.c.bf16 %v636_v61, %v634_v59  ;;  %v4044_v2 = vpack.c.bf16 %v829_v63, %v827_v60 }
 0x155   : > { %1765 = vmatmul.mubr.bf16.gmra.mrb[108].mxu0 %v4975_v15  ;;  %1958 = vmatmul.mubr.bf16.gmra.mrb[108].mxu1 %v4975_v15 }
 0x156   : > { %1368 = vst [vmem:[%s5057_s25 + $0x10] sm:$0xff] %v4043_v1  ;;  %1369 = vst [vmem:[%s5057_s25 + $0x18] sm:$0xff] %v4044_v2  ;;  %1774 = vmatprep.mubr.bf16.mxu0 %v4700_v0  ;;  %1967 = vmatprep.mubr.bf16.mxu1 %v4700_v0 }
 0x158   : > { %v640_v3 = vpop.f32.mrb[4].mxu0  ;;  %v833_v4 = vpop.f32.mrb[4].mxu1 }
 0x159   : > { %v642_v5 = vpop.f32.mrb[5].mxu0  ;;  %v835_v6 = vpop.f32.mrb[5].mxu1 }
 0x15a   : > { %v4045_v7 = vpack.c.bf16 %v642_v5, %v640_v3  ;;  %v4046_v20 = vpack.c.bf16 %v835_v6, %v833_v4  ;;  %v644_v21 = vpop.f32.mrb[6].mxu0  ;;  %v837_v22 = vpop.f32.mrb[6].mxu1 }
 0x15b   : > { %v646_v23 = vpop.f32.mrb[7].mxu0  ;;  %v839_v24 = vpop.f32.mrb[7].mxu1 }
 0x15c   : > { %1370 = vst [vmem:[%s5057_s25 + $0x20] sm:$0xff] %v4045_v7  ;;  %1371 = vst [vmem:[%s5057_s25 + $0x28] sm:$0xff] %v4046_v20  ;;  %v4047_v25 = vpack.c.bf16 %v646_v23, %v644_v21  ;;  %v4048_v26 = vpack.c.bf16 %v839_v24, %v837_v22 }
 0x15d   : > { %1775 = vmatmul.mubr.bf16.gmra.mrb[112].mxu0 %v4982_v16  ;;  %1968 = vmatmul.mubr.bf16.gmra.mrb[112].mxu1 %v4982_v16 }
 0x15e   : > { %1372 = vst [vmem:[%s5057_s25 + $0x30] sm:$0xff] %v4047_v25  ;;  %1373 = vst [vmem:[%s5057_s25 + $0x38] sm:$0xff] %v4048_v26  ;;  %1784 = vmatprep.mubr.bf16.mxu0 %v4700_v0  ;;  %1977 = vmatprep.mubr.bf16.mxu1 %v4700_v0 }
 0x160   : > { %v650_v27 = vpop.f32.mrb[8].mxu0  ;;  %v843_v28 = vpop.f32.mrb[8].mxu1 }
 0x161   : > { %v652_v29 = vpop.f32.mrb[9].mxu0  ;;  %v845_v30 = vpop.f32.mrb[9].mxu1 }
 0x162   : > { %v4049_v31 = vpack.c.bf16 %v652_v29, %v650_v27  ;;  %v4050_v32 = vpack.c.bf16 %v845_v30, %v843_v28  ;;  %v654_v33 = vpop.f32.mrb[10].mxu0  ;;  %v847_v34 = vpop.f32.mrb[10].mxu1 }
 0x163   : > { %v656_v36 = vpop.f32.mrb[11].mxu0  ;;  %v849_v37 = vpop.f32.mrb[11].mxu1 }
 0x164   : > { %1374 = vst [vmem:[%s5057_s25 + $0x40] sm:$0xff] %v4049_v31  ;;  %1375 = vst [vmem:[%s5057_s25 + $0x48] sm:$0xff] %v4050_v32  ;;  %v4051_v38 = vpack.c.bf16 %v656_v36, %v654_v33  ;;  %v4052_v39 = vpack.c.bf16 %v849_v37, %v847_v34 }
 0x165   : > { %1785 = vmatmul.mubr.bf16.gmra.mrb[116].mxu0 %v4989_v17  ;;  %1978 = vmatmul.mubr.bf16.gmra.mrb[116].mxu1 %v4989_v17 }
 0x166   : > { %1376 = vst [vmem:[%s5057_s25 + $0x50] sm:$0xff] %v4051_v38  ;;  %1377 = vst [vmem:[%s5057_s25 + $0x58] sm:$0xff] %v4052_v39  ;;  %1794 = vmatprep.mubr.bf16.mxu0 %v4700_v0  ;;  %1987 = vmatprep.mubr.bf16.mxu1 %v4700_v0 }
 0x168   : > { %v660_v40 = vpop.f32.mrb[12].mxu0  ;;  %v853_v41 = vpop.f32.mrb[12].mxu1 }
 0x169   : > { %v662_v42 = vpop.f32.mrb[13].mxu0  ;;  %v855_v43 = vpop.f32.mrb[13].mxu1 }
 0x16a   : > { %v4053_v45 = vpack.c.bf16 %v662_v42, %v660_v40  ;;  %v4054_v46 = vpack.c.bf16 %v855_v43, %v853_v41  ;;  %v664_v47 = vpop.f32.mrb[14].mxu0  ;;  %v857_v48 = vpop.f32.mrb[14].mxu1 }
 0x16b   : > { %v666_v49 = vpop.f32.mrb[15].mxu0  ;;  %v859_v51 = vpop.f32.mrb[15].mxu1 }
 0x16c   : > { %1378 = vst [vmem:[%s5057_s25 + $0x60] sm:$0xff] %v4053_v45  ;;  %1379 = vst [vmem:[%s5057_s25 + $0x68] sm:$0xff] %v4054_v46  ;;  %v4055_v52 = vpack.c.bf16 %v666_v49, %v664_v47  ;;  %v4056_v53 = vpack.c.bf16 %v859_v51, %v857_v48 }
 0x16d   : > { %1795 = vmatmul.mubr.bf16.gmra.mrb[120].mxu0 %v4996_v18  ;;  %1988 = vmatmul.mubr.bf16.gmra.mrb[120].mxu1 %v4996_v18 }
 0x16e   : > { %1380 = vst [vmem:[%s5057_s25 + $0x70] sm:$0xff] %v4055_v52  ;;  %1381 = vst [vmem:[%s5057_s25 + $0x78] sm:$0xff] %v4056_v53  ;;  %1804 = vmatprep.mubr.bf16.mxu0 %v4700_v0  ;;  %1997 = vmatprep.mubr.bf16.mxu1 %v4700_v0 }
 0x170   : > { %v670_v54 = vpop.f32.mrb[16].mxu0  ;;  %v863_v55 = vpop.f32.mrb[16].mxu1 }
 0x171   : > { %v672_v56 = vpop.f32.mrb[17].mxu0  ;;  %v865_v57 = vpop.f32.mrb[17].mxu1 }
 0x172   : > { %v4057_v58 = vpack.c.bf16 %v672_v56, %v670_v54  ;;  %v4058_v59 = vpack.c.bf16 %v865_v57, %v863_v55  ;;  %v674_v60 = vpop.f32.mrb[18].mxu0  ;;  %v867_v61 = vpop.f32.mrb[18].mxu1 }
 0x173   : > { %v676_v63 = vpop.f32.mrb[19].mxu0  ;;  %v869_v1 = vpop.f32.mrb[19].mxu1 }
 0x174   : > { %1382 = vst [vmem:[%s5057_s25 + $0x80] sm:$0xff] %v4057_v58  ;;  %1383 = vst [vmem:[%s5057_s25 + $0x88] sm:$0xff] %v4058_v59  ;;  %v4059_v2 = vpack.c.bf16 %v676_v63, %v674_v60  ;;  %v4060_v3 = vpack.c.bf16 %v869_v1, %v867_v61 }
 0x175   : > { %1805 = vmatmul.mubr.bf16.gmra.mrb[124].mxu0 %v5003_v19  ;;  %1998 = vmatmul.mubr.bf16.gmra.mrb[124].mxu1 %v5003_v19 }
 0x176   : > { %1384 = vst [vmem:[%s5057_s25 + $0x90] sm:$0xff] %v4059_v2  ;;  %1385 = vst [vmem:[%s5057_s25 + $0x98] sm:$0xff] %v4060_v3  ;;  %2680 = vmatprep.mubr.bf16.mxu0 %v4700_v0  ;;  %2873 = vmatprep.mubr.bf16.mxu1 %v4700_v0 }
 0x178   : > { %v680_v4 = vpop.f32.mrb[20].mxu0  ;;  %v873_v5 = vpop.f32.mrb[20].mxu1 }
 0x179   : > { %v682_v6 = vpop.f32.mrb[21].mxu0  ;;  %v875_v7 = vpop.f32.mrb[21].mxu1 }
 0x17a   : > { %v4061_v20 = vpack.c.bf16 %v682_v6, %v680_v4  ;;  %v4062_v21 = vpack.c.bf16 %v875_v7, %v873_v5  ;;  %v684_v22 = vpop.f32.mrb[22].mxu0  ;;  %v877_v23 = vpop.f32.mrb[22].mxu1 }
 0x17b   : > { %v686_v24 = vpop.f32.mrb[23].mxu0  ;;  %v879_v25 = vpop.f32.mrb[23].mxu1 }
 0x17c   : > { %1386 = vst [vmem:[%s5057_s25 + $0xa0] sm:$0xff] %v4061_v20  ;;  %1387 = vst [vmem:[%s5057_s25 + $0xa8] sm:$0xff] %v4062_v21  ;;  %v4063_v19 = vpack.c.bf16 %v686_v24, %v684_v22  ;;  %v4064_v26 = vpack.c.bf16 %v879_v25, %v877_v23 }
 0x17d   : > { %2681 = vmatmul.mubr.bf16.vlgmr.msra.gmra.mrb[128].mxu0 %v4898_v35  ;;  %2874 = vmatmul.mubr.bf16.vlgmr.msra.gmra.mrb[128].mxu1 %v4898_v35 }
 0x17e   : > { %1388 = vst [vmem:[%s5057_s25 + $0xb0] sm:$0xff] %v4063_v19  ;;  %1389 = vst [vmem:[%s5057_s25 + $0xb8] sm:$0xff] %v4064_v26  ;;  %2690 = vmatprep.mubr.bf16.mxu0 %v4700_v0  ;;  %2883 = vmatprep.mubr.bf16.mxu1 %v4700_v0 }
 0x180   : > { %v690_v27 = vpop.f32.mrb[24].mxu0  ;;  %v883_v28 = vpop.f32.mrb[24].mxu1 }
 0x181   : > { %v692_v29 = vpop.f32.mrb[25].mxu0  ;;  %v885_v30 = vpop.f32.mrb[25].mxu1 }
 0x182   : > { %v4065_v31 = vpack.c.bf16 %v692_v29, %v690_v27  ;;  %v4066_v32 = vpack.c.bf16 %v885_v30, %v883_v28  ;;  %v694_v33 = vpop.f32.mrb[26].mxu0  ;;  %v887_v34 = vpop.f32.mrb[26].mxu1 }
 0x183   : > { %v696_v36 = vpop.f32.mrb[27].mxu0  ;;  %v889_v37 = vpop.f32.mrb[27].mxu1 }
 0x184   : > { %1390 = vst [vmem:[%s5057_s25 + $0xc0] sm:$0xff] %v4065_v31  ;;  %1391 = vst [vmem:[%s5057_s25 + $0xc8] sm:$0xff] %v4066_v32  ;;  %v4067_v35 = vpack.c.bf16 %v696_v36, %v694_v33  ;;  %v4068_v38 = vpack.c.bf16 %v889_v37, %v887_v34 }
 0x185   : > { %2691 = vmatmul.mubr.bf16.gmra.mrb[132].mxu0 %v4905_v44  ;;  %2884 = vmatmul.mubr.bf16.gmra.mrb[132].mxu1 %v4905_v44 }
 0x186   : > { %1392 = vst [vmem:[%s5057_s25 + $0xd0] sm:$0xff] %v4067_v35  ;;  %1393 = vst [vmem:[%s5057_s25 + $0xd8] sm:$0xff] %v4068_v38  ;;  %2700 = vmatprep.mubr.bf16.mxu0 %v4700_v0  ;;  %2893 = vmatprep.mubr.bf16.mxu1 %v4700_v0 }
 0x188   : > { %v700_v39 = vpop.f32.mrb[28].mxu0  ;;  %v893_v40 = vpop.f32.mrb[28].mxu1 }
 0x189   : > { %v702_v41 = vpop.f32.mrb[29].mxu0  ;;  %v895_v42 = vpop.f32.mrb[29].mxu1 }
 0x18a   : > { %v4069_v43 = vpack.c.bf16 %v702_v41, %v700_v39  ;;  %v4070_v45 = vpack.c.bf16 %v895_v42, %v893_v40  ;;  %v704_v46 = vpop.f32.mrb[30].mxu0  ;;  %v897_v47 = vpop.f32.mrb[30].mxu1 }
 0x18b   : > { %v706_v48 = vpop.f32.mrb[31].mxu0  ;;  %v899_v49 = vpop.f32.mrb[31].mxu1 }
 0x18c   : > { %1394 = vst [vmem:[%s5057_s25 + $0xe0] sm:$0xff] %v4069_v43  ;;  %1395 = vst [vmem:[%s5057_s25 + $0xe8] sm:$0xff] %v4070_v45  ;;  %v4071_v44 = vpack.c.bf16 %v706_v48, %v704_v46  ;;  %v4072_v51 = vpack.c.bf16 %v899_v49, %v897_v47 }
 0x18d   : > { %2701 = vmatmul.mubr.bf16.gmra.mrb[136].mxu0 %v4912_v50  ;;  %2894 = vmatmul.mubr.bf16.gmra.mrb[136].mxu1 %v4912_v50 }
 0x18e   : > { %1396 = vst [vmem:[%s5057_s25 + $0xf0] sm:$0xff] %v4071_v44  ;;  %1397 = vst [vmem:[%s5057_s25 + $0xf8] sm:$0xff] %v4072_v51  ;;  %2710 = vmatprep.mubr.bf16.mxu0 %v4700_v0  ;;  %2903 = vmatprep.mubr.bf16.mxu1 %v4700_v0 }
 0x190   : > { %v710_v52 = vpop.f32.mrb[32].mxu0  ;;  %v903_v53 = vpop.f32.mrb[32].mxu1 }
 0x191   : > { %v712_v54 = vpop.f32.mrb[33].mxu0  ;;  %v905_v55 = vpop.f32.mrb[33].mxu1 }
 0x192   : > { %v4073_v56 = vpack.c.bf16 %v712_v54, %v710_v52  ;;  %v4074_v57 = vpack.c.bf16 %v905_v55, %v903_v53  ;;  %v714_v58 = vpop.f32.mrb[34].mxu0  ;;  %v907_v59 = vpop.f32.mrb[34].mxu1 }
 0x193   : > { %v716_v60 = vpop.f32.mrb[35].mxu0  ;;  %v909_v61 = vpop.f32.mrb[35].mxu1 }
 0x194   : > { %1398 = vst [vmem:[%s5057_s25 + $0x100] sm:$0xff] %v4073_v56  ;;  %1399 = vst [vmem:[%s5057_s25 + $0x108] sm:$0xff] %v4074_v57  ;;  %v4075_v50 = vpack.c.bf16 %v716_v60, %v714_v58  ;;  %v4076_v63 = vpack.c.bf16 %v909_v61, %v907_v59 }
 0x195   : > { %2711 = vmatmul.mubr.bf16.gmra.mrb[140].mxu0 %v4919_v62  ;;  %2904 = vmatmul.mubr.bf16.gmra.mrb[140].mxu1 %v4919_v62 }
 0x196   : > { %1400 = vst [vmem:[%s5057_s25 + $0x110] sm:$0xff] %v4075_v50  ;;  %1401 = vst [vmem:[%s5057_s25 + $0x118] sm:$0xff] %v4076_v63  ;;  %2720 = vmatprep.mubr.bf16.mxu0 %v4700_v0  ;;  %2913 = vmatprep.mubr.bf16.mxu1 %v4700_v0 }
 0x198   : > { %v720_v1 = vpop.f32.mrb[36].mxu0  ;;  %v913_v2 = vpop.f32.mrb[36].mxu1 }
 0x199   : > { %v722_v3 = vpop.f32.mrb[37].mxu0  ;;  %v915_v4 = vpop.f32.mrb[37].mxu1 }
 0x19a   : > { %v4077_v5 = vpack.c.bf16 %v722_v3, %v720_v1  ;;  %v4078_v6 = vpack.c.bf16 %v915_v4, %v913_v2  ;;  %v724_v7 = vpop.f32.mrb[38].mxu0  ;;  %v917_v20 = vpop.f32.mrb[38].mxu1 }
 0x19b   : > { %v726_v21 = vpop.f32.mrb[39].mxu0  ;;  %v919_v22 = vpop.f32.mrb[39].mxu1 }
 0x19c   : > { %1402 = vst [vmem:[%s5057_s25 + $0x120] sm:$0xff] %v4077_v5  ;;  %1403 = vst [vmem:[%s5057_s25 + $0x128] sm:$0xff] %v4078_v6  ;;  %v4079_v62 = vpack.c.bf16 %v726_v21, %v724_v7  ;;  %v4080_v23 = vpack.c.bf16 %v919_v22, %v917_v20 }
 0x19d   : > { %2721 = vmatmul.mubr.bf16.gmra.mrb[144].mxu0 %v4926_v8  ;;  %2914 = vmatmul.mubr.bf16.gmra.mrb[144].mxu1 %v4926_v8 }
 0x19e   : > { %1404 = vst [vmem:[%s5057_s25 + $0x130] sm:$0xff] %v4079_v62  ;;  %1405 = vst [vmem:[%s5057_s25 + $0x138] sm:$0xff] %v4080_v23  ;;  %2730 = vmatprep.mubr.bf16.mxu0 %v4700_v0  ;;  %2923 = vmatprep.mubr.bf16.mxu1 %v4700_v0 }
 0x1a0   : > { %v730_v24 = vpop.f32.mrb[40].mxu0  ;;  %v923_v25 = vpop.f32.mrb[40].mxu1 }
 0x1a1   : > { %v732_v19 = vpop.f32.mrb[41].mxu0  ;;  %v925_v26 = vpop.f32.mrb[41].mxu1 }
 0x1a2   : > { %v4081_v27 = vpack.c.bf16 %v732_v19, %v730_v24  ;;  %v4082_v28 = vpack.c.bf16 %v925_v26, %v923_v25  ;;  %v734_v29 = vpop.f32.mrb[42].mxu0  ;;  %v927_v30 = vpop.f32.mrb[42].mxu1 }
 0x1a3   : > { %v736_v31 = vpop.f32.mrb[43].mxu0  ;;  %v929_v32 = vpop.f32.mrb[43].mxu1 }
 0x1a4   : > { %1406 = vst [vmem:[%s5057_s25 + $0x140] sm:$0xff] %v4081_v27  ;;  %1407 = vst [vmem:[%s5057_s25 + $0x148] sm:$0xff] %v4082_v28  ;;  %v4083_v8 = vpack.c.bf16 %v736_v31, %v734_v29  ;;  %v4084_v33 = vpack.c.bf16 %v929_v32, %v927_v30 }
 0x1a5   : > { %2731 = vmatmul.mubr.bf16.gmra.mrb[148].mxu0 %v4933_v9  ;;  %2924 = vmatmul.mubr.bf16.gmra.mrb[148].mxu1 %v4933_v9 }
 0x1a6   : > { %1408 = vst [vmem:[%s5057_s25 + $0x150] sm:$0xff] %v4083_v8  ;;  %1409 = vst [vmem:[%s5057_s25 + $0x158] sm:$0xff] %v4084_v33  ;;  %2740 = vmatprep.mubr.bf16.mxu0 %v4700_v0  ;;  %2933 = vmatprep.mubr.bf16.mxu1 %v4700_v0 }
 0x1a8   : > { %v740_v34 = vpop.f32.mrb[44].mxu0  ;;  %v933_v36 = vpop.f32.mrb[44].mxu1 }
 0x1a9   : > { %v742_v37 = vpop.f32.mrb[45].mxu0  ;;  %v935_v35 = vpop.f32.mrb[45].mxu1 }
 0x1aa   : > { %v4085_v38 = vpack.c.bf16 %v742_v37, %v740_v34  ;;  %v4086_v39 = vpack.c.bf16 %v935_v35, %v933_v36  ;;  %v744_v40 = vpop.f32.mrb[46].mxu0  ;;  %v937_v41 = vpop.f32.mrb[46].mxu1 }
 0x1ab   : > { %v746_v42 = vpop.f32.mrb[47].mxu0  ;;  %v939_v43 = vpop.f32.mrb[47].mxu1 }
 0x1ac   : > { %1410 = vst [vmem:[%s5057_s25 + $0x160] sm:$0xff] %v4085_v38  ;;  %1411 = vst [vmem:[%s5057_s25 + $0x168] sm:$0xff] %v4086_v39  ;;  %v4087_v9 = vpack.c.bf16 %v746_v42, %v744_v40  ;;  %v4088_v45 = vpack.c.bf16 %v939_v43, %v937_v41 }
 0x1ad   : > { %2741 = vmatmul.mubr.bf16.gmra.mrb[152].mxu0 %v4940_v10  ;;  %2934 = vmatmul.mubr.bf16.gmra.mrb[152].mxu1 %v4940_v10 }
 0x1ae   : > { %1412 = vst [vmem:[%s5057_s25 + $0x170] sm:$0xff] %v4087_v9  ;;  %1413 = vst [vmem:[%s5057_s25 + $0x178] sm:$0xff] %v4088_v45  ;;  %2750 = vmatprep.mubr.bf16.mxu0 %v4700_v0  ;;  %2943 = vmatprep.mubr.bf16.mxu1 %v4700_v0 }
 0x1b0   : > { %v750_v46 = vpop.f32.mrb[48].mxu0  ;;  %v943_v47 = vpop.f32.mrb[48].mxu1 }
 0x1b1   : > { %v752_v48 = vpop.f32.mrb[49].mxu0  ;;  %v945_v49 = vpop.f32.mrb[49].mxu1 }
 0x1b2   : > { %v4089_v44 = vpack.c.bf16 %v752_v48, %v750_v46  ;;  %v4090_v51 = vpack.c.bf16 %v945_v49, %v943_v47  ;;  %v754_v52 = vpop.f32.mrb[50].mxu0  ;;  %v947_v53 = vpop.f32.mrb[50].mxu1 }
 0x1b3   : > { %v756_v54 = vpop.f32.mrb[51].mxu0  ;;  %v949_v55 = vpop.f32.mrb[51].mxu1 }
 0x1b4   : > { %1414 = vst [vmem:[%s5057_s25 + $0x180] sm:$0xff] %v4089_v44  ;;  %1415 = vst [vmem:[%s5057_s25 + $0x188] sm:$0xff] %v4090_v51  ;;  %v4091_v10 = vpack.c.bf16 %v756_v54, %v754_v52  ;;  %v4092_v56 = vpack.c.bf16 %v949_v55, %v947_v53 }
 0x1b5   : > { %2751 = vmatmul.mubr.bf16.gmra.mrb[156].mxu0 %v4947_v11  ;;  %2944 = vmatmul.mubr.bf16.gmra.mrb[156].mxu1 %v4947_v11 }
 0x1b6   : > { %1416 = vst [vmem:[%s5057_s25 + $0x190] sm:$0xff] %v4091_v10  ;;  %1417 = vst [vmem:[%s5057_s25 + $0x198] sm:$0xff] %v4092_v56  ;;  %2760 = vmatprep.mubr.bf16.mxu0 %v4700_v0  ;;  %2953 = vmatprep.mubr.bf16.mxu1 %v4700_v0 }
 0x1b8   : > { %v760_v57 = vpop.f32.mrb[52].mxu0  ;;  %v953_v58 = vpop.f32.mrb[52].mxu1 }
 0x1b9   : > { %v762_v59 = vpop.f32.mrb[53].mxu0  ;;  %v955_v60 = vpop.f32.mrb[53].mxu1 }
 0x1ba   : > { %v4093_v61 = vpack.c.bf16 %v762_v59, %v760_v57  ;;  %v4094_v50 = vpack.c.bf16 %v955_v60, %v953_v58  ;;  %v764_v63 = vpop.f32.mrb[54].mxu0  ;;  %v957_v1 = vpop.f32.mrb[54].mxu1 }
 0x1bb   : > { %v766_v2 = vpop.f32.mrb[55].mxu0  ;;  %v959_v3 = vpop.f32.mrb[55].mxu1 }
 0x1bc   : > { %1418 = vst [vmem:[%s5057_s25 + $0x1a0] sm:$0xff] %v4093_v61  ;;  %1419 = vst [vmem:[%s5057_s25 + $0x1a8] sm:$0xff] %v4094_v50  ;;  %v4095_v11 = vpack.c.bf16 %v766_v2, %v764_v63  ;;  %v4096_v4 = vpack.c.bf16 %v959_v3, %v957_v1 }
 0x1bd   : > { %2761 = vmatmul.mubr.bf16.gmra.mrb[160].mxu0 %v4954_v12  ;;  %2954 = vmatmul.mubr.bf16.gmra.mrb[160].mxu1 %v4954_v12 }
 0x1be   : > { %1420 = vst [vmem:[%s5057_s25 + $0x1b0] sm:$0xff] %v4095_v11  ;;  %1421 = vst [vmem:[%s5057_s25 + $0x1b8] sm:$0xff] %v4096_v4  ;;  %2770 = vmatprep.mubr.bf16.mxu0 %v4700_v0  ;;  %2963 = vmatprep.mubr.bf16.mxu1 %v4700_v0 }
 0x1c0   : > { %v770_v5 = vpop.f32.mrb[56].mxu0  ;;  %v963_v6 = vpop.f32.mrb[56].mxu1 }
 0x1c1   : > { %v772_v7 = vpop.f32.mrb[57].mxu0  ;;  %v965_v20 = vpop.f32.mrb[57].mxu1 }
 0x1c2   : > { %v4097_v21 = vpack.c.bf16 %v772_v7, %v770_v5  ;;  %v4098_v22 = vpack.c.bf16 %v965_v20, %v963_v6  ;;  %v774_v62 = vpop.f32.mrb[58].mxu0  ;;  %v967_v23 = vpop.f32.mrb[58].mxu1 }
 0x1c3   : > { %v776_v24 = vpop.f32.mrb[59].mxu0  ;;  %v969_v25 = vpop.f32.mrb[59].mxu1 }
 0x1c4   : > { %1422 = vst [vmem:[%s5057_s25 + $0x1c0] sm:$0xff] %v4097_v21  ;;  %1423 = vst [vmem:[%s5057_s25 + $0x1c8] sm:$0xff] %v4098_v22  ;;  %v4099_v12 = vpack.c.bf16 %v776_v24, %v774_v62  ;;  %v4100_v19 = vpack.c.bf16 %v969_v25, %v967_v23 }
 0x1c5   : > { %2771 = vmatmul.mubr.bf16.gmra.mrb[164].mxu0 %v4961_v13  ;;  %2964 = vmatmul.mubr.bf16.gmra.mrb[164].mxu1 %v4961_v13 }
 0x1c6   : > { %1424 = vst [vmem:[%s5057_s25 + $0x1d0] sm:$0xff] %v4099_v12  ;;  %1425 = vst [vmem:[%s5057_s25 + $0x1d8] sm:$0xff] %v4100_v19  ;;  %2780 = vmatprep.mubr.bf16.mxu0 %v4700_v0  ;;  %2973 = vmatprep.mubr.bf16.mxu1 %v4700_v0  ;;  %v4486_v12 = vld [vmem:[%s4885_s13 + $0x70] sm:$0xff]  }
 0x1c8   : > { %v780_v26 = vpop.f32.mrb[60].mxu0  ;;  %v973_v27 = vpop.f32.mrb[60].mxu1 }
 0x1c9   : > { %v782_v28 = vpop.f32.mrb[61].mxu0  ;;  %v975_v29 = vpop.f32.mrb[61].mxu1 }
 0x1ca   : > { %v4101_v30 = vpack.c.bf16 %v782_v28, %v780_v26  ;;  %v4102_v31 = vpack.c.bf16 %v975_v29, %v973_v27  ;;  %v784_v32 = vpop.f32.mrb[62].mxu0  ;;  %v977_v8 = vpop.f32.mrb[62].mxu1 }
 0x1cb   : > { %v786_v33 = vpop.f32.mrb[63].mxu0  ;;  %v979_v34 = vpop.f32.mrb[63].mxu1 }
 0x1cc   : > { %1426 = vst [vmem:[%s5057_s25 + $0x1e0] sm:$0xff] %v4101_v30  ;;  %1427 = vst [vmem:[%s5057_s25 + $0x1e8] sm:$0xff] %v4102_v31  ;;  %v4103_v13 = vpack.c.bf16 %v786_v33, %v784_v32  ;;  %v4104_v36 = vpack.c.bf16 %v979_v34, %v977_v8 }
 0x1cd   : > { %2781 = vmatmul.mubr.bf16.gmra.mrb[168].mxu0 %v4968_v14  ;;  %2974 = vmatmul.mubr.bf16.gmra.mrb[168].mxu1 %v4968_v14 }
 0x1ce   : > { %1428 = vst [vmem:[%s5057_s25 + $0x1f0] sm:$0xff] %v4103_v13  ;;  %1429 = vst [vmem:[%s5057_s25 + $0x1f8] sm:$0xff] %v4104_v36  ;;  %2790 = vmatprep.mubr.bf16.mxu0 %v4700_v0  ;;  %2983 = vmatprep.mubr.bf16.mxu1 %v4700_v0  ;;  %v4487_v13 = vld [vmem:[%s4885_s13 + $0x78] sm:$0xff]  }
 0x1d0   : > { %v1656_v37 = vpop.f32.mrb[64].mxu0  ;;  %v1849_v35 = vpop.f32.mrb[64].mxu1 }
 0x1d1   : > { %v1658_v38 = vpop.f32.mrb[65].mxu0  ;;  %v1851_v39 = vpop.f32.mrb[65].mxu1 }
 0x1d2   : > { %v4105_v40 = vpack.c.bf16 %v1658_v38, %v1656_v37  ;;  %v4106_v41 = vpack.c.bf16 %v1851_v39, %v1849_v35  ;;  %v1660_v42 = vpop.f32.mrb[66].mxu0  ;;  %v1853_v43 = vpop.f32.mrb[66].mxu1 }
 0x1d3   : > { %v1662_v9 = vpop.f32.mrb[67].mxu0  ;;  %v1855_v45 = vpop.f32.mrb[67].mxu1 }
 0x1d4   : > { %2392 = vst [vmem:[%s5188_s12] sm:$0xff] %v4105_v40  ;;  %2393 = vst [vmem:[%s5188_s12 + $0x8] sm:$0xff] %v4106_v41  ;;  %v4107_v14 = vpack.c.bf16 %v1662_v9, %v1660_v42  ;;  %v4108_v46 = vpack.c.bf16 %v1855_v45, %v1853_v43 }
 0x1d5   : > { %2791 = vmatmul.mubr.bf16.gmra.mrb[172].mxu0 %v4975_v15  ;;  %2984 = vmatmul.mubr.bf16.gmra.mrb[172].mxu1 %v4975_v15 }
 0x1d6   : > { %2394 = vst [vmem:[%s5188_s12 + $0x10] sm:$0xff] %v4107_v14  ;;  %2395 = vst [vmem:[%s5188_s12 + $0x18] sm:$0xff] %v4108_v46  ;;  %2800 = vmatprep.mubr.bf16.mxu0 %v4700_v0  ;;  %2993 = vmatprep.mubr.bf16.mxu1 %v4700_v0 }
 0x1d8   : > { %v1666_v47 = vpop.f32.mrb[68].mxu0  ;;  %v1859_v48 = vpop.f32.mrb[68].mxu1 }
 0x1d9   : > { %v1668_v49 = vpop.f32.mrb[69].mxu0  ;;  %v1861_v44 = vpop.f32.mrb[69].mxu1 }
 0x1da   : > { %v4109_v51 = vpack.c.bf16 %v1668_v49, %v1666_v47  ;;  %v4110_v52 = vpack.c.bf16 %v1861_v44, %v1859_v48  ;;  %v1670_v53 = vpop.f32.mrb[70].mxu0  ;;  %v1863_v54 = vpop.f32.mrb[70].mxu1 }
 0x1db   : > { %v1672_v55 = vpop.f32.mrb[71].mxu0  ;;  %v1865_v10 = vpop.f32.mrb[71].mxu1 }
 0x1dc   : > { %2396 = vst [vmem:[%s5188_s12 + $0x20] sm:$0xff] %v4109_v51  ;;  %2397 = vst [vmem:[%s5188_s12 + $0x28] sm:$0xff] %v4110_v52  ;;  %v4111_v15 = vpack.c.bf16 %v1672_v55, %v1670_v53  ;;  %v4112_v56 = vpack.c.bf16 %v1865_v10, %v1863_v54 }
 0x1dd   : > { %2801 = vmatmul.mubr.bf16.gmra.mrb[176].mxu0 %v4982_v16  ;;  %2994 = vmatmul.mubr.bf16.gmra.mrb[176].mxu1 %v4982_v16 }
 0x1de   : > { %2398 = vst [vmem:[%s5188_s12 + $0x30] sm:$0xff] %v4111_v15  ;;  %2399 = vst [vmem:[%s5188_s12 + $0x38] sm:$0xff] %v4112_v56  ;;  %2810 = vmatprep.mubr.bf16.mxu0 %v4700_v0  ;;  %3003 = vmatprep.mubr.bf16.mxu1 %v4700_v0 }
 0x1e0   : > { %v1676_v57 = vpop.f32.mrb[72].mxu0  ;;  %v1869_v58 = vpop.f32.mrb[72].mxu1 }
 0x1e1   : > { %v1678_v59 = vpop.f32.mrb[73].mxu0  ;;  %v1871_v60 = vpop.f32.mrb[73].mxu1 }
 0x1e2   : > { %v4113_v61 = vpack.c.bf16 %v1678_v59, %v1676_v57  ;;  %v4114_v50 = vpack.c.bf16 %v1871_v60, %v1869_v58  ;;  %v1680_v63 = vpop.f32.mrb[74].mxu0  ;;  %v1873_v1 = vpop.f32.mrb[74].mxu1 }
 0x1e3   : > { %v1682_v2 = vpop.f32.mrb[75].mxu0  ;;  %v1875_v3 = vpop.f32.mrb[75].mxu1 }
 0x1e4   : > { %2400 = vst [vmem:[%s5188_s12 + $0x40] sm:$0xff] %v4113_v61  ;;  %2401 = vst [vmem:[%s5188_s12 + $0x48] sm:$0xff] %v4114_v50  ;;  %v4115_v16 = vpack.c.bf16 %v1682_v2, %v1680_v63  ;;  %v4116_v11 = vpack.c.bf16 %v1875_v3, %v1873_v1 }
 0x1e5   : > { %2811 = vmatmul.mubr.bf16.gmra.mrb[180].mxu0 %v4989_v17  ;;  %3004 = vmatmul.mubr.bf16.gmra.mrb[180].mxu1 %v4989_v17 }
 0x1e6   : > { %2402 = vst [vmem:[%s5188_s12 + $0x50] sm:$0xff] %v4115_v16  ;;  %2403 = vst [vmem:[%s5188_s12 + $0x58] sm:$0xff] %v4116_v11  ;;  %2820 = vmatprep.mubr.bf16.mxu0 %v4700_v0  ;;  %3013 = vmatprep.mubr.bf16.mxu1 %v4700_v0 }
 0x1e8   : > { %v1686_v4 = vpop.f32.mrb[76].mxu0  ;;  %v1879_v5 = vpop.f32.mrb[76].mxu1 }
 0x1e9   : > { %v1688_v6 = vpop.f32.mrb[77].mxu0  ;;  %v1881_v7 = vpop.f32.mrb[77].mxu1 }
 0x1ea   : > { %v4117_v20 = vpack.c.bf16 %v1688_v6, %v1686_v4  ;;  %v4118_v21 = vpack.c.bf16 %v1881_v7, %v1879_v5  ;;  %v1690_v22 = vpop.f32.mrb[78].mxu0  ;;  %v1883_v62 = vpop.f32.mrb[78].mxu1 }
 0x1eb   : > { %v1692_v23 = vpop.f32.mrb[79].mxu0  ;;  %v1885_v17 = vpop.f32.mrb[79].mxu1 }
 0x1ec   : > { %2404 = vst [vmem:[%s5188_s12 + $0x60] sm:$0xff] %v4117_v20  ;;  %2405 = vst [vmem:[%s5188_s12 + $0x68] sm:$0xff] %v4118_v21  ;;  %v4119_v24 = vpack.c.bf16 %v1692_v23, %v1690_v22  ;;  %v4120_v25 = vpack.c.bf16 %v1885_v17, %v1883_v62 }
 0x1ed   : > { %2821 = vmatmul.mubr.bf16.gmra.mrb[184].mxu0 %v4996_v18  ;;  %3014 = vmatmul.mubr.bf16.gmra.mrb[184].mxu1 %v4486_v12 }
 0x1ee   : > { %2406 = vst [vmem:[%s5188_s12 + $0x70] sm:$0xff] %v4119_v24  ;;  %2407 = vst [vmem:[%s5188_s12 + $0x78] sm:$0xff] %v4120_v25  ;;  %2830 = vmatprep.mubr.bf16.mxu0 %v4700_v0  ;;  %3023 = vmatprep.mubr.bf16.mxu1 %v4700_v0 }
 0x1f0   : > { %v1696_v19 = vpop.f32.mrb[80].mxu0  ;;  %v1889_v26 = vpop.f32.mrb[80].mxu1 }
 0x1f1   : > { %v1698_v27 = vpop.f32.mrb[81].mxu0  ;;  %v1891_v28 = vpop.f32.mrb[81].mxu1 }
 0x1f2   : > { %v4121_v29 = vpack.c.bf16 %v1698_v27, %v1696_v19  ;;  %v4122_v30 = vpack.c.bf16 %v1891_v28, %v1889_v26  ;;  %v1700_v18 = vpop.f32.mrb[82].mxu0  ;;  %v1893_v31 = vpop.f32.mrb[82].mxu1 }
 0x1f3   : > { %v1702_v32 = vpop.f32.mrb[83].mxu0  ;;  %v1895_v8 = vpop.f32.mrb[83].mxu1 }
 0x1f4   : > { %2408 = vst [vmem:[%s5188_s12 + $0x80] sm:$0xff] %v4121_v29  ;;  %2409 = vst [vmem:[%s5188_s12 + $0x88] sm:$0xff] %v4122_v30  ;;  %v4123_v33 = vpack.c.bf16 %v1702_v32, %v1700_v18  ;;  %v4124_v34 = vpack.c.bf16 %v1895_v8, %v1893_v31 }
 0x1f5   : > { %2831 = vmatmul.mubr.bf16.gmra.mrb[188].mxu0 %v4487_v13  ;;  %3024 = vmatmul.mubr.bf16.gmra.mrb[188].mxu1 %v4487_v13 }
 0x1f6   : > { %2410 = vst [vmem:[%s5188_s12 + $0x90] sm:$0xff] %v4123_v33  ;;  %2411 = vst [vmem:[%s5188_s12 + $0x98] sm:$0xff] %v4124_v34 }
 0x1f8   : > { %v1706_v0 = vpop.f32.mrb[84].mxu0  ;;  %v1899_v36 = vpop.f32.mrb[84].mxu1 }
 0x1f9   : > { %v1708_v37 = vpop.f32.mrb[85].mxu0  ;;  %v1901_v35 = vpop.f32.mrb[85].mxu1 }
 0x1fa   : > { %v4125_v38 = vpack.c.bf16 %v1708_v37, %v1706_v0  ;;  %v4126_v39 = vpack.c.bf16 %v1901_v35, %v1899_v36  ;;  %v1710_v40 = vpop.f32.mrb[86].mxu0  ;;  %v1903_v41 = vpop.f32.mrb[86].mxu1 }
 0x1fb   : > { %v1712_v42 = vpop.f32.mrb[87].mxu0  ;;  %v1905_v43 = vpop.f32.mrb[87].mxu1 }
 0x1fc   : > { %2412 = vst [vmem:[%s5188_s12 + $0xa0] sm:$0xff] %v4125_v38  ;;  %2413 = vst [vmem:[%s5188_s12 + $0xa8] sm:$0xff] %v4126_v39  ;;  %v4127_v9 = vpack.c.bf16 %v1712_v42, %v1710_v40  ;;  %v4128_v45 = vpack.c.bf16 %v1905_v43, %v1903_v41 }
 0x1fe   : > { %2414 = vst [vmem:[%s5188_s12 + $0xb0] sm:$0xff] %v4127_v9  ;;  %2415 = vst [vmem:[%s5188_s12 + $0xb8] sm:$0xff] %v4128_v45 }
 0x200   : > { %v1716_v14 = vpop.f32.mrb[88].mxu0  ;;  %v1909_v46 = vpop.f32.mrb[88].mxu1 }
 0x201   : > { %v1718_v47 = vpop.f32.mrb[89].mxu0  ;;  %v1911_v48 = vpop.f32.mrb[89].mxu1 }
 0x202   : > { %v4129_v49 = vpack.c.bf16 %v1718_v47, %v1716_v14  ;;  %v4130_v44 = vpack.c.bf16 %v1911_v48, %v1909_v46  ;;  %v1720_v51 = vpop.f32.mrb[90].mxu0  ;;  %v1913_v52 = vpop.f32.mrb[90].mxu1 }
 0x203   : > { %v1722_v53 = vpop.f32.mrb[91].mxu0  ;;  %v1915_v54 = vpop.f32.mrb[91].mxu1 }
 0x204   : > { %2416 = vst [vmem:[%s5188_s12 + $0xc0] sm:$0xff] %v4129_v49  ;;  %2417 = vst [vmem:[%s5188_s12 + $0xc8] sm:$0xff] %v4130_v44  ;;  %v4131_v55 = vpack.c.bf16 %v1722_v53, %v1720_v51  ;;  %v4132_v10 = vpack.c.bf16 %v1915_v54, %v1913_v52 }
 0x206   : > { %2418 = vst [vmem:[%s5188_s12 + $0xd0] sm:$0xff] %v4131_v55  ;;  %2419 = vst [vmem:[%s5188_s12 + $0xd8] sm:$0xff] %v4132_v10 }
 0x208   : > { %v1726_v15 = vpop.f32.mrb[92].mxu0  ;;  %v1919_v56 = vpop.f32.mrb[92].mxu1 }
 0x209   : > { %v1728_v57 = vpop.f32.mrb[93].mxu0  ;;  %v1921_v58 = vpop.f32.mrb[93].mxu1 }
 0x20a   : > { %v4133_v59 = vpack.c.bf16 %v1728_v57, %v1726_v15  ;;  %v4134_v60 = vpack.c.bf16 %v1921_v58, %v1919_v56  ;;  %v1730_v61 = vpop.f32.mrb[94].mxu0  ;;  %v1923_v50 = vpop.f32.mrb[94].mxu1 }
 0x20b   : > { %v1732_v63 = vpop.f32.mrb[95].mxu0  ;;  %v1925_v1 = vpop.f32.mrb[95].mxu1 }
 0x20c   : > { %2420 = vst [vmem:[%s5188_s12 + $0xe0] sm:$0xff] %v4133_v59  ;;  %2421 = vst [vmem:[%s5188_s12 + $0xe8] sm:$0xff] %v4134_v60  ;;  %v4135_v2 = vpack.c.bf16 %v1732_v63, %v1730_v61  ;;  %v4136_v3 = vpack.c.bf16 %v1925_v1, %v1923_v50 }
 0x20e   : > { %2422 = vst [vmem:[%s5188_s12 + $0xf0] sm:$0xff] %v4135_v2  ;;  %2423 = vst [vmem:[%s5188_s12 + $0xf8] sm:$0xff] %v4136_v3 }
 0x210   : > { %v1736_v16 = vpop.f32.mrb[96].mxu0  ;;  %v1929_v11 = vpop.f32.mrb[96].mxu1 }
 0x211   : > { %v1738_v4 = vpop.f32.mrb[97].mxu0  ;;  %v1931_v5 = vpop.f32.mrb[97].mxu1 }
 0x212   : > { %v4137_v6 = vpack.c.bf16 %v1738_v4, %v1736_v16  ;;  %v4138_v7 = vpack.c.bf16 %v1931_v5, %v1929_v11  ;;  %v1740_v20 = vpop.f32.mrb[98].mxu0  ;;  %v1933_v21 = vpop.f32.mrb[98].mxu1 }
 0x213   : > { %v1742_v22 = vpop.f32.mrb[99].mxu0  ;;  %v1935_v62 = vpop.f32.mrb[99].mxu1 }
 0x214   : > { %2424 = vst [vmem:[%s5188_s12 + $0x100] sm:$0xff] %v4137_v6  ;;  %2425 = vst [vmem:[%s5188_s12 + $0x108] sm:$0xff] %v4138_v7  ;;  %v4139_v23 = vpack.c.bf16 %v1742_v22, %v1740_v20  ;;  %v4140_v17 = vpack.c.bf16 %v1935_v62, %v1933_v21 }
 0x216   : > { %2426 = vst [vmem:[%s5188_s12 + $0x110] sm:$0xff] %v4139_v23  ;;  %2427 = vst [vmem:[%s5188_s12 + $0x118] sm:$0xff] %v4140_v17 }
 0x218   : > { %v1746_v24 = vpop.f32.mrb[100].mxu0  ;;  %v1939_v25 = vpop.f32.mrb[100].mxu1 }
 0x219   : > { %v1748_v12 = vpop.f32.mrb[101].mxu0  ;;  %v1941_v19 = vpop.f32.mrb[101].mxu1 }
 0x21a   : > { %v4141_v26 = vpack.c.bf16 %v1748_v12, %v1746_v24  ;;  %v4142_v27 = vpack.c.bf16 %v1941_v19, %v1939_v25  ;;  %v1750_v28 = vpop.f32.mrb[102].mxu0  ;;  %v1943_v29 = vpop.f32.mrb[102].mxu1 }
 0x21b   : > { %v1752_v30 = vpop.f32.mrb[103].mxu0  ;;  %v1945_v18 = vpop.f32.mrb[103].mxu1 }
 0x21c   : > { %2428 = vst [vmem:[%s5188_s12 + $0x120] sm:$0xff] %v4141_v26  ;;  %2429 = vst [vmem:[%s5188_s12 + $0x128] sm:$0xff] %v4142_v27  ;;  %v4143_v31 = vpack.c.bf16 %v1752_v30, %v1750_v28  ;;  %v4144_v32 = vpack.c.bf16 %v1945_v18, %v1943_v29 }
 0x21e   : > { %2430 = vst [vmem:[%s5188_s12 + $0x130] sm:$0xff] %v4143_v31  ;;  %2431 = vst [vmem:[%s5188_s12 + $0x138] sm:$0xff] %v4144_v32 }
 0x220   : > { %v1756_v8 = vpop.f32.mrb[104].mxu0  ;;  %v1949_v33 = vpop.f32.mrb[104].mxu1 }
 0x221   : > { %v1758_v34 = vpop.f32.mrb[105].mxu0  ;;  %v1951_v13 = vpop.f32.mrb[105].mxu1 }
 0x222   : > { %v4145_v0 = vpack.c.bf16 %v1758_v34, %v1756_v8  ;;  %v4146_v36 = vpack.c.bf16 %v1951_v13, %v1949_v33  ;;  %v1760_v37 = vpop.f32.mrb[106].mxu0  ;;  %v1953_v35 = vpop.f32.mrb[106].mxu1 }
 0x223   : > { %v1762_v38 = vpop.f32.mrb[107].mxu0  ;;  %v1955_v39 = vpop.f32.mrb[107].mxu1 }
 0x224   : > { %2432 = vst [vmem:[%s5188_s12 + $0x140] sm:$0xff] %v4145_v0  ;;  %2433 = vst [vmem:[%s5188_s12 + $0x148] sm:$0xff] %v4146_v36  ;;  %v4147_v40 = vpack.c.bf16 %v1762_v38, %v1760_v37  ;;  %v4148_v41 = vpack.c.bf16 %v1955_v39, %v1953_v35 }
 0x226   : > { %2434 = vst [vmem:[%s5188_s12 + $0x150] sm:$0xff] %v4147_v40  ;;  %2435 = vst [vmem:[%s5188_s12 + $0x158] sm:$0xff] %v4148_v41 }
 0x228   : > { %v1766_v42 = vpop.f32.mrb[108].mxu0  ;;  %v1959_v43 = vpop.f32.mrb[108].mxu1 }
 0x229   : > { %v1768_v9 = vpop.f32.mrb[109].mxu0  ;;  %v1961_v45 = vpop.f32.mrb[109].mxu1 }
 0x22a   : > { %v4149_v14 = vpack.c.bf16 %v1768_v9, %v1766_v42  ;;  %v4150_v46 = vpack.c.bf16 %v1961_v45, %v1959_v43  ;;  %v1770_v47 = vpop.f32.mrb[110].mxu0  ;;  %v1963_v48 = vpop.f32.mrb[110].mxu1 }
 0x22b   : > { %v1772_v49 = vpop.f32.mrb[111].mxu0  ;;  %v1965_v44 = vpop.f32.mrb[111].mxu1 }
 0x22c   : > { %2436 = vst [vmem:[%s5188_s12 + $0x160] sm:$0xff] %v4149_v14  ;;  %2437 = vst [vmem:[%s5188_s12 + $0x168] sm:$0xff] %v4150_v46  ;;  %v4151_v51 = vpack.c.bf16 %v1772_v49, %v1770_v47  ;;  %v4152_v52 = vpack.c.bf16 %v1965_v44, %v1963_v48 }
 0x22e   : > { %2438 = vst [vmem:[%s5188_s12 + $0x170] sm:$0xff] %v4151_v51  ;;  %2439 = vst [vmem:[%s5188_s12 + $0x178] sm:$0xff] %v4152_v52 }
 0x230   : > { %v1776_v53 = vpop.f32.mrb[112].mxu0  ;;  %v1969_v54 = vpop.f32.mrb[112].mxu1 }
 0x231   : > { %v1778_v55 = vpop.f32.mrb[113].mxu0  ;;  %v1971_v10 = vpop.f32.mrb[113].mxu1 }
 0x232   : > { %v4153_v15 = vpack.c.bf16 %v1778_v55, %v1776_v53  ;;  %v4154_v56 = vpack.c.bf16 %v1971_v10, %v1969_v54  ;;  %v1780_v57 = vpop.f32.mrb[114].mxu0  ;;  %v1973_v58 = vpop.f32.mrb[114].mxu1 }
 0x233   : > { %v1782_v59 = vpop.f32.mrb[115].mxu0  ;;  %v1975_v60 = vpop.f32.mrb[115].mxu1 }
 0x234   : > { %2440 = vst [vmem:[%s5188_s12 + $0x180] sm:$0xff] %v4153_v15  ;;  %2441 = vst [vmem:[%s5188_s12 + $0x188] sm:$0xff] %v4154_v56  ;;  %v4155_v61 = vpack.c.bf16 %v1782_v59, %v1780_v57  ;;  %v4156_v50 = vpack.c.bf16 %v1975_v60, %v1973_v58 }
 0x236   : > { %2442 = vst [vmem:[%s5188_s12 + $0x190] sm:$0xff] %v4155_v61  ;;  %2443 = vst [vmem:[%s5188_s12 + $0x198] sm:$0xff] %v4156_v50 }
 0x238   : > { %v1786_v63 = vpop.f32.mrb[116].mxu0  ;;  %v1979_v1 = vpop.f32.mrb[116].mxu1 }
 0x239   : > { %v1788_v2 = vpop.f32.mrb[117].mxu0  ;;  %v1981_v3 = vpop.f32.mrb[117].mxu1 }
 0x23a   : > { %v4157_v16 = vpack.c.bf16 %v1788_v2, %v1786_v63  ;;  %v4158_v11 = vpack.c.bf16 %v1981_v3, %v1979_v1  ;;  %v1790_v4 = vpop.f32.mrb[118].mxu0  ;;  %v1983_v5 = vpop.f32.mrb[118].mxu1 }
 0x23b   : > { %v1792_v6 = vpop.f32.mrb[119].mxu0  ;;  %v1985_v7 = vpop.f32.mrb[119].mxu1 }
 0x23c   : > { %2444 = vst [vmem:[%s5188_s12 + $0x1a0] sm:$0xff] %v4157_v16  ;;  %2445 = vst [vmem:[%s5188_s12 + $0x1a8] sm:$0xff] %v4158_v11  ;;  %v4159_v20 = vpack.c.bf16 %v1792_v6, %v1790_v4  ;;  %v4160_v21 = vpack.c.bf16 %v1985_v7, %v1983_v5 }
 0x23e   : > { %2446 = vst [vmem:[%s5188_s12 + $0x1b0] sm:$0xff] %v4159_v20  ;;  %2447 = vst [vmem:[%s5188_s12 + $0x1b8] sm:$0xff] %v4160_v21 }
 0x240   : > { %v1796_v22 = vpop.f32.mrb[120].mxu0  ;;  %v1989_v62 = vpop.f32.mrb[120].mxu1 }
 0x241   : > { %v1798_v23 = vpop.f32.mrb[121].mxu0  ;;  %v1991_v17 = vpop.f32.mrb[121].mxu1 }
 0x242   : > { %v4161_v24 = vpack.c.bf16 %v1798_v23, %v1796_v22  ;;  %v4162_v25 = vpack.c.bf16 %v1991_v17, %v1989_v62  ;;  %v1800_v12 = vpop.f32.mrb[122].mxu0  ;;  %v1993_v19 = vpop.f32.mrb[122].mxu1 }
 0x243   : > { %v1802_v26 = vpop.f32.mrb[123].mxu0  ;;  %v1995_v27 = vpop.f32.mrb[123].mxu1 }
 0x244   : > { %2448 = vst [vmem:[%s5188_s12 + $0x1c0] sm:$0xff] %v4161_v24  ;;  %2449 = vst [vmem:[%s5188_s12 + $0x1c8] sm:$0xff] %v4162_v25  ;;  %v4163_v28 = vpack.c.bf16 %v1802_v26, %v1800_v12  ;;  %v4164_v29 = vpack.c.bf16 %v1995_v27, %v1993_v19 }
 0x246   : > { %2450 = vst [vmem:[%s5188_s12 + $0x1d0] sm:$0xff] %v4163_v28  ;;  %2451 = vst [vmem:[%s5188_s12 + $0x1d8] sm:$0xff] %v4164_v29 }
 0x248   : > { %v1806_v30 = vpop.f32.mrb[124].mxu0  ;;  %v1999_v18 = vpop.f32.mrb[124].mxu1 }
 0x249   : > { %v1808_v31 = vpop.f32.mrb[125].mxu0  ;;  %v2001_v32 = vpop.f32.mrb[125].mxu1 }
 0x24a   : > { %v4165_v8 = vpack.c.bf16 %v1808_v31, %v1806_v30  ;;  %v4166_v33 = vpack.c.bf16 %v2001_v32, %v1999_v18  ;;  %v1810_v34 = vpop.f32.mrb[126].mxu0  ;;  %v2003_v13 = vpop.f32.mrb[126].mxu1 }
 0x24b   : > { %v1812_v0 = vpop.f32.mrb[127].mxu0  ;;  %v2005_v36 = vpop.f32.mrb[127].mxu1 }
 0x24c   : > { %2452 = vst [vmem:[%s5188_s12 + $0x1e0] sm:$0xff] %v4165_v8  ;;  %2453 = vst [vmem:[%s5188_s12 + $0x1e8] sm:$0xff] %v4166_v33  ;;  %v4167_v37 = vpack.c.bf16 %v1812_v0, %v1810_v34  ;;  %v4168_v35 = vpack.c.bf16 %v2005_v36, %v2003_v13 }
 0x24e   : > { %2454 = vst [vmem:[%s5188_s12 + $0x1f0] sm:$0xff] %v4167_v37  ;;  %2455 = vst [vmem:[%s5188_s12 + $0x1f8] sm:$0xff] %v4168_v35 }
 0x250   : > { %v2682_v38 = vpop.f32.mrb[128].mxu0  ;;  %v2875_v39 = vpop.f32.mrb[128].mxu1 }
 0x251   : > { %v2684_v40 = vpop.f32.mrb[129].mxu0  ;;  %v2877_v41 = vpop.f32.mrb[129].mxu1 }
 0x252   : > { %4559 = shalt.err (!%p4556_p9)
}
 0x253   : > { %s4560_s13 = scalar_lea.hbm %s5279_s9, 8192  ;;  %s4564_s30 = scalar_lea.hbm %s5476_s3, 16384 }
 0x254   : > { %p4561_p1 = scmp.ne.s32.totalorder %s5279_s9, %s4560_s13  ;;  %p4565_p7 = scmp.lt.u32.totalorder %s5279_s9, %s5476_s3 }
 0x255   : > { %p4566_p13 = scmp.lt.u32.totalorder %s4564_s30, %s4560_s13  ;;  %p4568_p6 = scmp.lt.u32.totalorder %s4560_s13, %s5279_s9 }
 0x256   : > { %p4562_p2 = pnand %p4561_p1, %p4825_p10 }
 0x257   : > { %p4567_p4 = por %p4566_p13, %p4565_p7 }
 0x258   : > { %p4563_p3 = pneg %p4562_p2 }
 0x259   : > { %p4569_p8 = por %p4568_p6, %p4567_p4 }
 0x25b   : > { %p4570_p12 = pnand %p4569_p8, %p4563_p3 }
 0x25d   : > { %4573 = shalt.err (!%p4570_p12)
}
 0x25e   : > { %s4702_s21 = smov 256   ;;  %s4703_s11 = smov 16   ;;  %v4169_v42 = vpack.c.bf16 %v2684_v40, %v2682_v38  ;;  %v4170_v43 = vpack.c.bf16 %v2877_v41, %v2875_v39  ;;  %v2686_v9 = vpop.f32.mrb[130].mxu0  ;;  %v2879_v45 = vpop.f32.mrb[130].mxu1 }
 0x25f   : > { %4243 = dma.vmem_to_hbm [thread:$0]  (%p4825_p10), %s5282_s28, 8192, %s5279_s9, %s5284_s18, %s4702_s21, %s4702_s21, %s4703_s11   ;;  %v2688_v14 = vpop.f32.mrb[131].mxu0  ;;  %v2881_v46 = vpop.f32.mrb[131].mxu1 }
 0x260   : > { %s5315_s12 = scalar_lea.hbm %s5475_s2, %s5271_s26  ;;  %s3509_s14 = sshll.u32 %s5057_s25, 4  ;;  %v4171_v47 = vpack.c.bf16 %v2688_v14, %v2686_v9  ;;  %v4172_v48 = vpack.c.bf16 %v2881_v46, %v2879_v45  ;;  %s5318_s14 = int_to_ptr.vmem [resolvable:$true] %s3509_s14 }
 0x261   : > { %s5321_s30 = scalar_lea.vmem [#allocation10], %s5052_s23  ;;  %s3483_s9 = scalar_lea.sflag [#allocation4], %s4881_s10 }
 0x262   : > { %3418 = vst [vmem:[%s5321_s30] sm:$0xff] %v4169_v42  ;;  %3419 = vst [vmem:[%s5321_s30 + $0x8] sm:$0xff] %v4170_v43  ;;  %s4574_s28 = scalar_lea.vmem %s5318_s14, 8192  ;;  %s4704_s25 = smov [#allocation7]  }
 0x263   : > { %p4575_p11 = scmp.ne.s32.totalorder %s5318_s14, %s4574_s28  ;;  %s4578_s7 = sshll.u32 %s4704_s25, 4  ;;  %s4579_s7 = int_to_ptr.vmem [resolvable:$false] %s4578_s7 }
 0x264   : > { %s4580_s5 = scalar_lea.vmem %s4579_s7, 16384  ;;  %p4581_p9 = scmp.lt.s32.totalorder %s5318_s14, %s4579_s7 }
 0x265   : > { %p4576_p0 = pnand %p4575_p11, %p4825_p10  ;;  %p4582_p1 = scmp.lt.s32.totalorder %s4580_s5, %s4574_s28 }
 0x267   : > { %p4577_p5 = pneg %p4576_p0  ;;  %p4583_p2 = por %p4582_p1, %p4581_p9 }
 0x269   : > { %p4584_p3 = pnand %p4583_p2, %p4577_p5 }
 0x26b   : > { %4587 = shalt.err (!%p4584_p3)
}
 0x26c   : > { %s4588_s23 = scalar_lea.hbm %s5315_s12, 8192  ;;  %s4592_s25 = scalar_lea.hbm %s5475_s2, 16384 }
 0x26d   : > { %p4589_p7 = scmp.ne.s32.totalorder %s5315_s12, %s4588_s23  ;;  %p4593_p6 = scmp.lt.u32.totalorder %s5315_s12, %s5475_s2 }
 0x26e   : > { %p4594_p8 = scmp.lt.u32.totalorder %s4592_s25, %s4588_s23  ;;  %p4596_p11 = scmp.lt.u32.totalorder %s4588_s23, %s5315_s12 }
 0x26f   : > { %p4590_p13 = pnand %p4589_p7, %p4825_p10 }
 0x270   : > { %p4595_p12 = por %p4594_p8, %p4593_p6 }
 0x271   : > { %p4591_p4 = pneg %p4590_p13 }
 0x272   : > { %p4597_p0 = por %p4596_p11, %p4595_p12 }
 0x274   : > { %p4598_p5 = pnand %p4597_p0, %p4591_p4 }
 0x276   : > { %4601 = shalt.err (!%p4598_p5)
}
 0x277   : > { %4242 = dma.vmem_to_hbm [thread:$0]  (%p4825_p10), %s5318_s14, 8192, %s5315_s12, %s3483_s9, %s4702_s21, %s4702_s21, %s4703_s11   ;;  %v2692_v49 = vpop.f32.mrb[132].mxu0  ;;  %v2885_v44 = vpop.f32.mrb[132].mxu1 }
 0x278   : > { %3420 = vst [vmem:[%s5321_s30 + $0x10] sm:$0xff] %v4171_v47  ;;  %3421 = vst [vmem:[%s5321_s30 + $0x18] sm:$0xff] %v4172_v48  ;;  %v2694_v51 = vpop.f32.mrb[133].mxu0  ;;  %v2887_v52 = vpop.f32.mrb[133].mxu1  ;;  %s3547_s22 = sshll.u32 %s5321_s30, 4  ;;  %s5417_s14 = scalar_lea.hbm %s5477_s4, %s5271_s26  ;;  %s5419_s22 = int_to_ptr.vmem [resolvable:$true] %s3547_s22 }
 0x279   : > { %v4173_v53 = vpack.c.bf16 %v2694_v51, %v2692_v49  ;;  %v4174_v54 = vpack.c.bf16 %v2887_v52, %v2885_v44  ;;  %v2696_v55 = vpop.f32.mrb[134].mxu0  ;;  %v2889_v10 = vpop.f32.mrb[134].mxu1  ;;  %s4602_s9 = scalar_lea.vmem %s5419_s22, 8192  ;;  %s4705_s28 = smov [#allocation10]  }
 0x27a   : > { %v2698_v15 = vpop.f32.mrb[135].mxu0  ;;  %v2891_v56 = vpop.f32.mrb[135].mxu1  ;;  %p4603_p9 = scmp.ne.s32.totalorder %s5419_s22, %s4602_s9  ;;  %s4606_s5 = sshll.u32 %s4705_s28, 4  ;;  %s4607_s5 = int_to_ptr.vmem [resolvable:$false] %s4606_s5 }
 0x27b   : > { %3422 = vst [vmem:[%s5321_s30 + $0x20] sm:$0xff] %v4173_v53  ;;  %3423 = vst [vmem:[%s5321_s30 + $0x28] sm:$0xff] %v4174_v54  ;;  %v4175_v57 = vpack.c.bf16 %v2698_v15, %v2696_v55  ;;  %v4176_v58 = vpack.c.bf16 %v2891_v56, %v2889_v10  ;;  %v2702_v59 = vpop.f32.mrb[136].mxu0  ;;  %v2895_v60 = vpop.f32.mrb[136].mxu1  ;;  %s4608_s23 = scalar_lea.vmem %s4607_s5, 16384  ;;  %p4609_p3 = scmp.lt.s32.totalorder %s5419_s22, %s4607_s5 }
 0x27c   : > { %v2704_v61 = vpop.f32.mrb[137].mxu0  ;;  %v2897_v50 = vpop.f32.mrb[137].mxu1  ;;  %p4604_p1 = pnand %p4603_p9, %p4825_p10  ;;  %p4610_p7 = scmp.lt.s32.totalorder %s4608_s23, %s4602_s9 }
 0x27d   : > { %3424 = vst [vmem:[%s5321_s30 + $0x30] sm:$0xff] %v4175_v57  ;;  %3425 = vst [vmem:[%s5321_s30 + $0x38] sm:$0xff] %v4176_v58  ;;  %v4177_v63 = vpack.c.bf16 %v2704_v61, %v2702_v59  ;;  %v4178_v1 = vpack.c.bf16 %v2897_v50, %v2895_v60  ;;  %v2706_v2 = vpop.f32.mrb[138].mxu0  ;;  %v2899_v3 = vpop.f32.mrb[138].mxu1 }
 0x27e   : > { %v2708_v16 = vpop.f32.mrb[139].mxu0  ;;  %v2901_v11 = vpop.f32.mrb[139].mxu1  ;;  %p4605_p2 = pneg %p4604_p1  ;;  %p4611_p13 = por %p4610_p7, %p4609_p3 }
 0x27f   : > { %3426 = vst [vmem:[%s5321_s30 + $0x40] sm:$0xff] %v4177_v63  ;;  %3427 = vst [vmem:[%s5321_s30 + $0x48] sm:$0xff] %v4178_v1  ;;  %v4179_v4 = vpack.c.bf16 %v2708_v16, %v2706_v2  ;;  %v4180_v5 = vpack.c.bf16 %v2901_v11, %v2899_v3  ;;  %v2712_v6 = vpop.f32.mrb[140].mxu0  ;;  %v2905_v7 = vpop.f32.mrb[140].mxu1 }
 0x280   : > { %v2714_v20 = vpop.f32.mrb[141].mxu0  ;;  %v2907_v21 = vpop.f32.mrb[141].mxu1  ;;  %p4612_p4 = pnand %p4611_p13, %p4605_p2 }
 0x281   : > { %3428 = vst [vmem:[%s5321_s30 + $0x50] sm:$0xff] %v4179_v4  ;;  %3429 = vst [vmem:[%s5321_s30 + $0x58] sm:$0xff] %v4180_v5  ;;  %v4181_v22 = vpack.c.bf16 %v2714_v20, %v2712_v6  ;;  %v4182_v62 = vpack.c.bf16 %v2907_v21, %v2905_v7  ;;  %v2716_v23 = vpop.f32.mrb[142].mxu0  ;;  %v2909_v17 = vpop.f32.mrb[142].mxu1 }
 0x282   : > { %v2718_v24 = vpop.f32.mrb[143].mxu0  ;;  %v2911_v25 = vpop.f32.mrb[143].mxu1 }
 0x283   : > { %3430 = vst [vmem:[%s5321_s30 + $0x60] sm:$0xff] %v4181_v22  ;;  %3431 = vst [vmem:[%s5321_s30 + $0x68] sm:$0xff] %v4182_v62  ;;  %v4183_v12 = vpack.c.bf16 %v2718_v24, %v2716_v23  ;;  %v4184_v19 = vpack.c.bf16 %v2911_v25, %v2909_v17  ;;  %v2722_v26 = vpop.f32.mrb[144].mxu0  ;;  %v2915_v27 = vpop.f32.mrb[144].mxu1 }
 0x284   : > { %v2724_v28 = vpop.f32.mrb[145].mxu0  ;;  %v2917_v29 = vpop.f32.mrb[145].mxu1 }
 0x285   : > { %3432 = vst [vmem:[%s5321_s30 + $0x70] sm:$0xff] %v4183_v12  ;;  %3433 = vst [vmem:[%s5321_s30 + $0x78] sm:$0xff] %v4184_v19  ;;  %v4185_v30 = vpack.c.bf16 %v2724_v28, %v2722_v26  ;;  %v4186_v18 = vpack.c.bf16 %v2917_v29, %v2915_v27  ;;  %v2726_v31 = vpop.f32.mrb[146].mxu0  ;;  %v2919_v32 = vpop.f32.mrb[146].mxu1 }
 0x286   : > { %v2728_v8 = vpop.f32.mrb[147].mxu0  ;;  %v2921_v33 = vpop.f32.mrb[147].mxu1 }
 0x287   : > { %3434 = vst [vmem:[%s5321_s30 + $0x80] sm:$0xff] %v4185_v30  ;;  %3435 = vst [vmem:[%s5321_s30 + $0x88] sm:$0xff] %v4186_v18  ;;  %v4187_v34 = vpack.c.bf16 %v2728_v8, %v2726_v31  ;;  %v4188_v13 = vpack.c.bf16 %v2921_v33, %v2919_v32  ;;  %v2732_v0 = vpop.f32.mrb[148].mxu0  ;;  %v2925_v36 = vpop.f32.mrb[148].mxu1 }
 0x288   : > { %v2734_v37 = vpop.f32.mrb[149].mxu0  ;;  %v2927_v35 = vpop.f32.mrb[149].mxu1 }
 0x289   : > { %3436 = vst [vmem:[%s5321_s30 + $0x90] sm:$0xff] %v4187_v34  ;;  %3437 = vst [vmem:[%s5321_s30 + $0x98] sm:$0xff] %v4188_v13  ;;  %v4189_v38 = vpack.c.bf16 %v2734_v37, %v2732_v0  ;;  %v4190_v39 = vpack.c.bf16 %v2927_v35, %v2925_v36  ;;  %v2736_v40 = vpop.f32.mrb[150].mxu0  ;;  %v2929_v41 = vpop.f32.mrb[150].mxu1 }
 0x28a   : > { %v2738_v42 = vpop.f32.mrb[151].mxu0  ;;  %v2931_v43 = vpop.f32.mrb[151].mxu1 }
 0x28b   : > { %3438 = vst [vmem:[%s5321_s30 + $0xa0] sm:$0xff] %v4189_v38  ;;  %3439 = vst [vmem:[%s5321_s30 + $0xa8] sm:$0xff] %v4190_v39  ;;  %v4191_v9 = vpack.c.bf16 %v2738_v42, %v2736_v40  ;;  %v4192_v45 = vpack.c.bf16 %v2931_v43, %v2929_v41  ;;  %v2742_v14 = vpop.f32.mrb[152].mxu0  ;;  %v2935_v46 = vpop.f32.mrb[152].mxu1 }
 0x28c   : > { %v2744_v47 = vpop.f32.mrb[153].mxu0  ;;  %v2937_v48 = vpop.f32.mrb[153].mxu1 }
 0x28d   : > { %3440 = vst [vmem:[%s5321_s30 + $0xb0] sm:$0xff] %v4191_v9  ;;  %3441 = vst [vmem:[%s5321_s30 + $0xb8] sm:$0xff] %v4192_v45  ;;  %v4193_v49 = vpack.c.bf16 %v2744_v47, %v2742_v14  ;;  %v4194_v44 = vpack.c.bf16 %v2937_v48, %v2935_v46  ;;  %v2746_v51 = vpop.f32.mrb[154].mxu0  ;;  %v2939_v52 = vpop.f32.mrb[154].mxu1 }
 0x28e   : > { %v2748_v53 = vpop.f32.mrb[155].mxu0  ;;  %v2941_v54 = vpop.f32.mrb[155].mxu1 }
 0x28f   : > { %3442 = vst [vmem:[%s5321_s30 + $0xc0] sm:$0xff] %v4193_v49  ;;  %3443 = vst [vmem:[%s5321_s30 + $0xc8] sm:$0xff] %v4194_v44  ;;  %v4195_v55 = vpack.c.bf16 %v2748_v53, %v2746_v51  ;;  %v4196_v10 = vpack.c.bf16 %v2941_v54, %v2939_v52  ;;  %v2752_v15 = vpop.f32.mrb[156].mxu0  ;;  %v2945_v56 = vpop.f32.mrb[156].mxu1 }
 0x290   : > { %v2754_v57 = vpop.f32.mrb[157].mxu0  ;;  %v2947_v58 = vpop.f32.mrb[157].mxu1 }
 0x291   : > { %3444 = vst [vmem:[%s5321_s30 + $0xd0] sm:$0xff] %v4195_v55  ;;  %3445 = vst [vmem:[%s5321_s30 + $0xd8] sm:$0xff] %v4196_v10  ;;  %v4197_v59 = vpack.c.bf16 %v2754_v57, %v2752_v15  ;;  %v4198_v60 = vpack.c.bf16 %v2947_v58, %v2945_v56  ;;  %v2756_v61 = vpop.f32.mrb[158].mxu0  ;;  %v2949_v50 = vpop.f32.mrb[158].mxu1 }
 0x292   : > { %v2758_v63 = vpop.f32.mrb[159].mxu0  ;;  %v2951_v1 = vpop.f32.mrb[159].mxu1 }
 0x293   : > { %3446 = vst [vmem:[%s5321_s30 + $0xe0] sm:$0xff] %v4197_v59  ;;  %3447 = vst [vmem:[%s5321_s30 + $0xe8] sm:$0xff] %v4198_v60  ;;  %v4199_v2 = vpack.c.bf16 %v2758_v63, %v2756_v61  ;;  %v4200_v3 = vpack.c.bf16 %v2951_v1, %v2949_v50  ;;  %v2762_v16 = vpop.f32.mrb[160].mxu0  ;;  %v2955_v11 = vpop.f32.mrb[160].mxu1 }
 0x294   : > { %v2764_v4 = vpop.f32.mrb[161].mxu0  ;;  %v2957_v5 = vpop.f32.mrb[161].mxu1 }
 0x295   : > { %3448 = vst [vmem:[%s5321_s30 + $0xf0] sm:$0xff] %v4199_v2  ;;  %3449 = vst [vmem:[%s5321_s30 + $0xf8] sm:$0xff] %v4200_v3  ;;  %v4201_v6 = vpack.c.bf16 %v2764_v4, %v2762_v16  ;;  %v4202_v7 = vpack.c.bf16 %v2957_v5, %v2955_v11  ;;  %v2766_v20 = vpop.f32.mrb[162].mxu0  ;;  %v2959_v21 = vpop.f32.mrb[162].mxu1 }
 0x296   : > { %v2768_v22 = vpop.f32.mrb[163].mxu0  ;;  %v2961_v62 = vpop.f32.mrb[163].mxu1 }
 0x297   : > { %3450 = vst [vmem:[%s5321_s30 + $0x100] sm:$0xff] %v4201_v6  ;;  %3451 = vst [vmem:[%s5321_s30 + $0x108] sm:$0xff] %v4202_v7  ;;  %v4203_v23 = vpack.c.bf16 %v2768_v22, %v2766_v20  ;;  %v4204_v17 = vpack.c.bf16 %v2961_v62, %v2959_v21 }
 0x298   : > { %v2772_v24 = vpop.f32.mrb[164].mxu0  ;;  %v2965_v25 = vpop.f32.mrb[164].mxu1 }
 0x299   : > { %3452 = vst [vmem:[%s5321_s30 + $0x110] sm:$0xff] %v4203_v23  ;;  %3453 = vst [vmem:[%s5321_s30 + $0x118] sm:$0xff] %v4204_v17  ;;  %v2774_v12 = vpop.f32.mrb[165].mxu0  ;;  %v2967_v19 = vpop.f32.mrb[165].mxu1 }
 0x29a   : > { %v4205_v26 = vpack.c.bf16 %v2774_v12, %v2772_v24  ;;  %v4206_v27 = vpack.c.bf16 %v2967_v19, %v2965_v25  ;;  %v2776_v28 = vpop.f32.mrb[166].mxu0  ;;  %v2969_v29 = vpop.f32.mrb[166].mxu1 }
 0x29b   : > { %v2778_v30 = vpop.f32.mrb[167].mxu0  ;;  %v2971_v18 = vpop.f32.mrb[167].mxu1 }
 0x29c   : > { %3454 = vst [vmem:[%s5321_s30 + $0x120] sm:$0xff] %v4205_v26  ;;  %3455 = vst [vmem:[%s5321_s30 + $0x128] sm:$0xff] %v4206_v27  ;;  %v4207_v31 = vpack.c.bf16 %v2778_v30, %v2776_v28  ;;  %v4208_v32 = vpack.c.bf16 %v2971_v18, %v2969_v29 }
 0x29e   : > { %3456 = vst [vmem:[%s5321_s30 + $0x130] sm:$0xff] %v4207_v31  ;;  %3457 = vst [vmem:[%s5321_s30 + $0x138] sm:$0xff] %v4208_v32 }
 0x2a0   : > { %v2782_v8 = vpop.f32.mrb[168].mxu0  ;;  %v2975_v33 = vpop.f32.mrb[168].mxu1 }
 0x2a1   : > { %v2784_v34 = vpop.f32.mrb[169].mxu0  ;;  %v2977_v13 = vpop.f32.mrb[169].mxu1 }
 0x2a2   : > { %v4209_v0 = vpack.c.bf16 %v2784_v34, %v2782_v8  ;;  %v4210_v36 = vpack.c.bf16 %v2977_v13, %v2975_v33  ;;  %v2786_v37 = vpop.f32.mrb[170].mxu0  ;;  %v2979_v35 = vpop.f32.mrb[170].mxu1 }
 0x2a3   : > { %v2788_v38 = vpop.f32.mrb[171].mxu0  ;;  %v2981_v39 = vpop.f32.mrb[171].mxu1 }
 0x2a4   : > { %3458 = vst [vmem:[%s5321_s30 + $0x140] sm:$0xff] %v4209_v0  ;;  %3459 = vst [vmem:[%s5321_s30 + $0x148] sm:$0xff] %v4210_v36  ;;  %v4211_v40 = vpack.c.bf16 %v2788_v38, %v2786_v37  ;;  %v4212_v41 = vpack.c.bf16 %v2981_v39, %v2979_v35 }
 0x2a6   : > { %3460 = vst [vmem:[%s5321_s30 + $0x150] sm:$0xff] %v4211_v40  ;;  %3461 = vst [vmem:[%s5321_s30 + $0x158] sm:$0xff] %v4212_v41 }
 0x2a8   : > { %v2792_v42 = vpop.f32.mrb[172].mxu0  ;;  %v2985_v43 = vpop.f32.mrb[172].mxu1 }
 0x2a9   : > { %v2794_v9 = vpop.f32.mrb[173].mxu0  ;;  %v2987_v45 = vpop.f32.mrb[173].mxu1 }
 0x2aa   : > { %v4213_v14 = vpack.c.bf16 %v2794_v9, %v2792_v42  ;;  %v4214_v46 = vpack.c.bf16 %v2987_v45, %v2985_v43  ;;  %v2796_v47 = vpop.f32.mrb[174].mxu0  ;;  %v2989_v48 = vpop.f32.mrb[174].mxu1 }
 0x2ab   : > { %v2798_v49 = vpop.f32.mrb[175].mxu0  ;;  %v2991_v44 = vpop.f32.mrb[175].mxu1 }
 0x2ac   : > { %3462 = vst [vmem:[%s5321_s30 + $0x160] sm:$0xff] %v4213_v14  ;;  %3463 = vst [vmem:[%s5321_s30 + $0x168] sm:$0xff] %v4214_v46  ;;  %v4215_v51 = vpack.c.bf16 %v2798_v49, %v2796_v47  ;;  %v4216_v52 = vpack.c.bf16 %v2991_v44, %v2989_v48 }
 0x2ae   : > { %3464 = vst [vmem:[%s5321_s30 + $0x170] sm:$0xff] %v4215_v51  ;;  %3465 = vst [vmem:[%s5321_s30 + $0x178] sm:$0xff] %v4216_v52 }
 0x2b0   : > { %v2802_v53 = vpop.f32.mrb[176].mxu0  ;;  %v2995_v54 = vpop.f32.mrb[176].mxu1 }
 0x2b1   : > { %v2804_v55 = vpop.f32.mrb[177].mxu0  ;;  %v2997_v10 = vpop.f32.mrb[177].mxu1 }
 0x2b2   : > { %v4217_v15 = vpack.c.bf16 %v2804_v55, %v2802_v53  ;;  %v4218_v56 = vpack.c.bf16 %v2997_v10, %v2995_v54  ;;  %v2806_v57 = vpop.f32.mrb[178].mxu0  ;;  %v2999_v58 = vpop.f32.mrb[178].mxu1 }
 0x2b3   : > { %v2808_v59 = vpop.f32.mrb[179].mxu0  ;;  %v3001_v60 = vpop.f32.mrb[179].mxu1 }
 0x2b4   : > { %3466 = vst [vmem:[%s5321_s30 + $0x180] sm:$0xff] %v4217_v15  ;;  %3467 = vst [vmem:[%s5321_s30 + $0x188] sm:$0xff] %v4218_v56  ;;  %v4219_v61 = vpack.c.bf16 %v2808_v59, %v2806_v57  ;;  %v4220_v50 = vpack.c.bf16 %v3001_v60, %v2999_v58 }
 0x2b6   : > { %3468 = vst [vmem:[%s5321_s30 + $0x190] sm:$0xff] %v4219_v61  ;;  %3469 = vst [vmem:[%s5321_s30 + $0x198] sm:$0xff] %v4220_v50 }
 0x2b8   : > { %v2812_v63 = vpop.f32.mrb[180].mxu0  ;;  %v3005_v1 = vpop.f32.mrb[180].mxu1 }
 0x2b9   : > { %v2814_v2 = vpop.f32.mrb[181].mxu0  ;;  %v3007_v3 = vpop.f32.mrb[181].mxu1 }
 0x2ba   : > { %v4221_v16 = vpack.c.bf16 %v2814_v2, %v2812_v63  ;;  %v4222_v11 = vpack.c.bf16 %v3007_v3, %v3005_v1  ;;  %v2816_v4 = vpop.f32.mrb[182].mxu0  ;;  %v3009_v5 = vpop.f32.mrb[182].mxu1 }
 0x2bb   : > { %v2818_v6 = vpop.f32.mrb[183].mxu0  ;;  %v3011_v7 = vpop.f32.mrb[183].mxu1 }
 0x2bc   : > { %3470 = vst [vmem:[%s5321_s30 + $0x1a0] sm:$0xff] %v4221_v16  ;;  %3471 = vst [vmem:[%s5321_s30 + $0x1a8] sm:$0xff] %v4222_v11  ;;  %v4223_v20 = vpack.c.bf16 %v2818_v6, %v2816_v4  ;;  %v4224_v21 = vpack.c.bf16 %v3011_v7, %v3009_v5 }
 0x2be   : > { %3472 = vst [vmem:[%s5321_s30 + $0x1b0] sm:$0xff] %v4223_v20  ;;  %3473 = vst [vmem:[%s5321_s30 + $0x1b8] sm:$0xff] %v4224_v21 }
 0x2c0   : > { %v2822_v22 = vpop.f32.mrb[184].mxu0  ;;  %v3015_v62 = vpop.f32.mrb[184].mxu1 }
 0x2c1   : > { %v2824_v23 = vpop.f32.mrb[185].mxu0  ;;  %v3017_v17 = vpop.f32.mrb[185].mxu1 }
 0x2c2   : > { %v4225_v24 = vpack.c.bf16 %v2824_v23, %v2822_v22  ;;  %v4226_v25 = vpack.c.bf16 %v3017_v17, %v3015_v62  ;;  %v2826_v12 = vpop.f32.mrb[186].mxu0  ;;  %v3019_v19 = vpop.f32.mrb[186].mxu1 }
 0x2c3   : > { %v2828_v26 = vpop.f32.mrb[187].mxu0  ;;  %v3021_v27 = vpop.f32.mrb[187].mxu1 }
 0x2c4   : > { %3474 = vst [vmem:[%s5321_s30 + $0x1c0] sm:$0xff] %v4225_v24  ;;  %3475 = vst [vmem:[%s5321_s30 + $0x1c8] sm:$0xff] %v4226_v25  ;;  %v4227_v28 = vpack.c.bf16 %v2828_v26, %v2826_v12  ;;  %v4228_v29 = vpack.c.bf16 %v3021_v27, %v3019_v19 }
 0x2c6   : > { %3476 = vst [vmem:[%s5321_s30 + $0x1d0] sm:$0xff] %v4227_v28  ;;  %3477 = vst [vmem:[%s5321_s30 + $0x1d8] sm:$0xff] %v4228_v29 }
 0x2c8   : > { %v2832_v30 = vpop.f32.mrb[188].mxu0  ;;  %v3025_v18 = vpop.f32.mrb[188].mxu1 }
 0x2c9   : > { %v2834_v31 = vpop.f32.mrb[189].mxu0  ;;  %v3027_v32 = vpop.f32.mrb[189].mxu1 }
 0x2ca   : > { %v4229_v8 = vpack.c.bf16 %v2834_v31, %v2832_v30  ;;  %v4230_v33 = vpack.c.bf16 %v3027_v32, %v3025_v18  ;;  %v2836_v34 = vpop.f32.mrb[190].mxu0  ;;  %v3029_v13 = vpop.f32.mrb[190].mxu1 }
 0x2cb   : > { %v2838_v0 = vpop.f32.mrb[191].mxu0  ;;  %v3031_v36 = vpop.f32.mrb[191].mxu1 }
 0x2cc   : > { %3478 = vst [vmem:[%s5321_s30 + $0x1e0] sm:$0xff] %v4229_v8  ;;  %3479 = vst [vmem:[%s5321_s30 + $0x1e8] sm:$0xff] %v4230_v33  ;;  %v4231_v37 = vpack.c.bf16 %v2838_v0, %v2836_v34  ;;  %v4232_v35 = vpack.c.bf16 %v3031_v36, %v3029_v13 }
 0x2ce   : > { %3480 = vst [vmem:[%s5321_s30 + $0x1f0] sm:$0xff] %v4231_v37  ;;  %3481 = vst [vmem:[%s5321_s30 + $0x1f8] sm:$0xff] %v4232_v35 }
 0x2cf   : > { %4615 = shalt.err (!%p4612_p4)
}
 0x2d0   : > { %s4616_s26 = scalar_lea.hbm %s5417_s14, 8192  ;;  %s4620_s13 = scalar_lea.hbm %s5477_s4, 16384 }
 0x2d1   : > { %p4617_p6 = scmp.ne.s32.totalorder %s5417_s14, %s4616_s26  ;;  %p4621_p11 = scmp.lt.u32.totalorder %s5417_s14, %s5477_s4 }
 0x2d2   : > { %p4622_p0 = scmp.lt.u32.totalorder %s4620_s13, %s4616_s26  ;;  %p4624_p9 = scmp.lt.u32.totalorder %s4616_s26, %s5417_s14 }
 0x2d3   : > { %p4618_p8 = pnand %p4617_p6, %p4825_p10 }
 0x2d4   : > { %p4623_p5 = por %p4622_p0, %p4621_p11 }
 0x2d5   : > { %p4619_p12 = pneg %p4618_p8 }
 0x2d6   : > { %p4625_p1 = por %p4624_p9, %p4623_p5 }
 0x2d8   : > { %p4626_p2 = pnand %p4625_p1, %p4619_p12 }
 0x2da   : > { %4629 = shalt.err (!%p4626_p2)
}
 0x2db   : > { %4244 = dma.vmem_to_hbm [thread:$0]  (%p4825_p10), %s5419_s22, 8192, %s5417_s14, %s5284_s18, %s4702_s21, %s4702_s21, %s4703_s11  }
 0x2dc PF: > { %s3562_s10 = sand.u32 1, %s4672_s15   ;;  %p5494_p3 = scmp.ne.s32.totalorder %s5483_s24, 0 }
 0x2dd   : > { %p5495_p7 = scmp.ge.s32.totalorder %s4692_s20, 2  ;;  %s3563_s12 = scalar_lea.sflag [#allocation4], %s3562_s10 }
 0x2df   : > { %p4257_p13 = pnand %p5495_p7, %p5494_p3 }
 0x2e1   : > { %4663 = dma.done.wait (!%p4257_p13), %s3563_s12, 8192  }
 0x2e2   : > { %4665 = vsyncadd (!%p4257_p13), %s3563_s12, 4294959104  ;;  %s5496_s6 = sadd.s32 4294967294, %s4692_s20  }
 0x2e3   : > { %s3571_s9 = sand.u32 1, %s5496_s6  }
 0x2e4   : > { %s3572_s28 = scalar_lea.sflag [#allocation9], %s3571_s9 }
 0x2e5   : > { %4667 = dma.done.wait (!%p4257_p13), %s3572_s28, 16384  }
 0x2e6   : > { %4669 = vsyncadd (!%p4257_p13), %s3572_s28, 4294950912  ;;  %s25_s20 = sadd.s32 1, %s4692_s20   ;;  %s5497_s15 = smov %s4676_s16 }
 0x2e7   : > { %p22_p10 = scmp.ge.s32.totalorder %s25_s20, 4   ;;  %s5498_s16 = smov %s4680_s17 }
 0x2e8   : > { %s5499_s17 = smov %s4834_s8  ;;  %s5500_s18 = smov %s4688_s19 }
 0x2e9   : > { %s5501_s19 = smov %s5503_s29  ;;  %24 = sbr.rel (!%p22_p10) target bundleno = 9 (0x9), region = 109 }
 0x2f0   :  { %3586 = vsyncpa [#allocation3], 1 }
 0x2f1   :  { %3588 = vsyncpa [#allocation3 + $0x1], 1 }
 0x2f2   :  { %3589 = vsyncpa [#allocation6], 1 }
 0x2f3   :  { %3590 = vsyncpa [#allocation4], 1 }
 0x2f4   :  { %3592 = vsyncpa [#allocation4 + $0x1], 1 }
 0x2f5   :  { %3593 = vsyncpa [#allocation9], 1 }
 0x2f6   :  { %3595 = vsyncpa [#allocation9 + $0x1], 1 }

</bundles_post_ra>
